<compile_context>
chip_gen: v7x
topology: tpu7x:2x2x1
jax: 0.10.0
libtpu: 0.0.40
codegen_flags: <defaults>
</compile_context>

<pallas_src>
import functools

import jax
import jax.numpy as jnp
from jax.experimental import pallas as pl
from jax.experimental.pallas import tpu as pltpu

F32 = jnp.float32


# --------------------------------------------------------------------------
# Fused per-batch kernel.
# --------------------------------------------------------------------------
def _efgn_kernel(feat_ref, mask_ref,
                 wi_ref, bi_ref,
                 wxy_ref, bxy_ref,
                 wstep_ref, bstep_ref, bag_ref,
                 we_ref,
                 wv2_ref, bv_ref,
                 wo_ref, bo_ref,
                 out_ref, *, l, h, n_step):
    f_in = feat_ref[0]                         # (l, n_inp)
    msk = mask_ref[0]                          # (l, 1)

    # Hoist bias broadcasts out of the (unrolled) step loop.
    bstep_b = jnp.broadcast_to(bstep_ref[...], (l, 6 * h))
    bag_b = jnp.broadcast_to(bag_ref[...], (l, h))
    bv_b = jnp.broadcast_to(bv_ref[...], (l, h))

    # ---- input projection: feat_v = xform_inp(feat) ----
    f_v = jnp.dot(f_in, wi_ref[...], preferred_element_type=F32) + bi_ref[...]

    # ---- edge init: feat_e[i,j] = f[i]@Wx^T + f[j]@Wy^T + bxf ----
    # single N=2h matmul; bxf is folded into the x-half bias.
    ac = jnp.dot(f_v, wxy_ref[...], preferred_element_type=F32) + bxy_ref[...]
    ax0 = ac[:, :h]
    ay0 = ac[:, h:]
    fe = ax0[:, None, :] + ay0[None, :, :]     # (l, l, h)

    # ---- n_step message-passing iterations (unrolled) ----
    for _ in range(n_step):
        # One merged edge matmul on the OLD edges:
        #   ec = [old_e @ Wu2^T | old_e @ Wu2^T Wat^T]
        ec = jnp.dot(fe.reshape(l * l, h), we_ref[...],
                     preferred_element_type=F32)            # (l*l, 2h)
        eu = ec[:, :h].reshape(l, l, h)
        eu_at = ec[:, h:].reshape(l, l, h)

        # One merged per-vertex matmul:
        #   [f@wxu | f@wyu | f@Wag^T | f@Wag^T Wv1^T | f@wxu Wat^T | f@wyu Wat^T]
        vc = jnp.dot(f_v, wstep_ref[...],
                     preferred_element_type=F32) + bstep_b   # (l, 6h)
        ax = vc[:, 0 * h:1 * h]      # fresh-edge x half (edge bias folded in)
        ay = vc[:, 1 * h:2 * h]      # fresh-edge y half
        gv = vc[:, 2 * h:3 * h]      # f @ Wag^T            (pre-mask, pre-bias)
        gvv = vc[:, 3 * h:4 * h]     # f @ Wag^T Wv1^T      (xhid branch of upd_v)
        axat = vc[:, 4 * h:5 * h]    # attn logits, x half  (bat + folds baked in)
        ayat = vc[:, 5 * h:6 * h]    # attn logits, y half

        # New edges and their attention logits (pure VPU adds).
        fe = ax[:, None, :] + ay[None, :, :] + eu            # new feat_e
        attn = axat[:, None, :] + ayat[None, :, :] + eu_at   # attn_v(new feat_e)

        # vertex update
        xhid = msk * gv + bag_b                               # agg_v(f_v*mask)
        m = jnp.max(attn, axis=0, keepdims=True)              # softmax over i
        p = jnp.exp(attn - m)                                 # (l_i, l_j, h)
        s = jnp.sum(p, axis=0)                                # (l_j, h)
        num = jnp.sum(p * xhid[:, None, :], axis=0)           # (l_j, h)
        agg = num * pl.reciprocal(s, approx=True)
        agg = pl.reciprocal(1.0 + jnp.exp(-agg), approx=True)   # sigmoid
        # upd_v(cat([xhid, agg])) with the xhid branch pre-folded into gvv
        f_v = (msk * gvv
               + jnp.dot(agg, wv2_ref[...], preferred_element_type=F32)
               + bv_b)

    # ---- output projection ----
    out_ref[0] = (jnp.dot(f_v, wo_ref[...], preferred_element_type=F32)
                  + bo_ref[...])


# --------------------------------------------------------------------------
# Wrapper: weight transposition / algebraic folding / single pallas_call.
# --------------------------------------------------------------------------
def pallas_forward(params, feat, mask, n_step=3):
    n, l, n_inp = feat.shape
    h = params['Wi'].shape[0]
    hp = jax.lax.Precision.HIGHEST

    wi_t, bi = params['Wi'].T, params['bi'][None, :]
    wo_t, bo = params['Wo'].T, params['bo'][None, :]

    wx_t = params['Wxf'][:, :h].T            # acts on feat_v[b, i]
    wy_t = params['Wxf'][:, h:].T            # acts on feat_v[b, j]
    bxf = params['bxf'][None, :]

    wu1_t = params['Wue'][:, :h].T           # acts on fresh outer-concat edge
    wu2_t = params['Wue'][:, h:].T           # acts on previous feat_e
    bue = params['bue'][None, :]

    wag_t, bag = params['Wag'].T, params['bag'][None, :]
    wat_t, bat = params['Wat'].T, params['bat'][None, :]

    wv1_t = params['Wuv'][:, :h].T           # acts on xhid
    wv2_t = params['Wuv'][:, h:].T           # acts on agg
    buv = params['buv'][None, :]

    # --- algebraic folds (tiny h x h products, done once in the wrapper) ---
    wxu = jnp.dot(wx_t, wu1_t, precision=hp)          # fresh-edge x -> upd_e
    wyu = jnp.dot(wy_t, wu1_t, precision=hp)          # fresh-edge y -> upd_e
    b_fold = jnp.dot(bxf, wu1_t, precision=hp) + bue  # folded edge bias
    wagv1 = jnp.dot(wag_t, wv1_t, precision=hp)       # agg_v -> upd_v (xhid)
    b_v = jnp.dot(bag, wv1_t, precision=hp) + buv

    wxu_at = jnp.dot(wxu, wat_t, precision=hp)        # attn logits, x half
    wyu_at = jnp.dot(wyu, wat_t, precision=hp)        # attn logits, y half
    b_at = jnp.dot(b_fold, wat_t, precision=hp) + bat
    wu2_at = jnp.dot(wu2_t, wat_t, precision=hp)      # attn logits, old-edge half

    # --- merged weights for lane-dense MXU passes ---
    w_xy = jnp.concatenate([wx_t, wy_t], axis=1)                    # (h, 2h)
    b_xy = jnp.concatenate([bxf, jnp.zeros_like(bxf)], axis=1)      # (1, 2h)
    w_step = jnp.concatenate([wxu, wyu, wag_t, wagv1,
                              wxu_at, wyu_at], axis=1)              # (h, 6h)
    b_step = jnp.concatenate([b_fold, jnp.zeros((1, 3 * h), F32),
                              b_at, jnp.zeros((1, h), F32)], axis=1)  # (1, 6h)
    w_e = jnp.concatenate([wu2_t, wu2_at], axis=1)                  # (h, 2h)

    mask3 = mask.astype(F32).reshape(n, l, 1)

    kernel = functools.partial(_efgn_kernel, l=l, h=h, n_step=n_step)

    return pl.pallas_call(
        kernel,
        out_shape=jax.ShapeDtypeStruct((n, l, n_inp), F32),
        grid=(n,),
        in_specs=[
            pl.BlockSpec((1, l, n_inp), lambda b: (b, 0, 0)),   # feat
            pl.BlockSpec((1, l, 1), lambda b: (b, 0, 0)),       # mask
            pl.BlockSpec((n_inp, h), lambda b: (0, 0)),         # Wi^T
            pl.BlockSpec((1, h), lambda b: (0, 0)),             # bi
            pl.BlockSpec((h, 2 * h), lambda b: (0, 0)),         # [Wx|Wy]^T
            pl.BlockSpec((1, 2 * h), lambda b: (0, 0)),         # [bxf|0]
            pl.BlockSpec((h, 6 * h), lambda b: (0, 0)),         # merged step wt
            pl.BlockSpec((1, 6 * h), lambda b: (0, 0)),         # merged step bias
            pl.BlockSpec((1, h), lambda b: (0, 0)),             # bag
            pl.BlockSpec((h, 2 * h), lambda b: (0, 0)),         # [Wu2^T|Wu2^T Wat^T]
            pl.BlockSpec((h, h), lambda b: (0, 0)),             # Wv2^T
            pl.BlockSpec((1, h), lambda b: (0, 0)),             # folded b_v
            pl.BlockSpec((h, n_inp), lambda b: (0, 0)),         # Wo^T
            pl.BlockSpec((1, n_inp), lambda b: (0, 0)),         # bo
        ],
        out_specs=pl.BlockSpec((1, l, n_inp), lambda b: (b, 0, 0)),
        compiler_params=pltpu.CompilerParams(
            dimension_semantics=("parallel",)),
    )(feat, mask3, wi_t, bi, w_xy, b_xy, w_step, b_step, bag,
      w_e, wv2_t, b_v, wo_t, bo)


# --------------------------------------------------------------------------
# Parameter init (deterministic, PyTorch-Linear-like uniform).
# --------------------------------------------------------------------------
def init_params(key, n_inp, n_inn):
    keys = jax.random.split(key, 14)

    def lin_init(kw, kb, fan_in, fan_out):
        bound = float(fan_in) ** -0.5
        w = jax.random.uniform(kw, (fan_out, fan_in), F32, -bound, bound)
        b = jax.random.uniform(kb, (fan_out,), F32, -bound, bound)
        return w, b

    p = {}
    p['Wi'], p['bi'] = lin_init(keys[0], keys[1], n_inp, n_inn)          # xform_inp
    p['Wo'], p['bo'] = lin_init(keys[2], keys[3], n_inn, n_inp)          # xform_oup
    p['Wxf'], p['bxf'] = lin_init(keys[4], keys[5], 2 * n_inn, n_inn)    # xform_feat_e
    p['Wue'], p['bue'] = lin_init(keys[6], keys[7], 2 * n_inn, n_inn)    # upd_e
    p['Wag'], p['bag'] = lin_init(keys[8], keys[9], n_inn, n_inn)        # agg_v
    p['Wuv'], p['buv'] = lin_init(keys[10], keys[11], 2 * n_inn, n_inn)  # upd_v
    p['Wat'], p['bat'] = lin_init(keys[12], keys[13], n_inn, n_inn)      # attn_v
    return p


# --------------------------------------------------------------------------
# Pure-JAX reference (mirrors the PyTorch module literally) for validation.
# --------------------------------------------------------------------------
def ref_forward(params, feat, mask, n_step=3):
    hp = jax.lax.Precision.HIGHEST

    def lin(x, w, b):
        return jnp.dot(x, w.T, precision=hp) + b

    def outer_concat(f):
        n, l, c = f.shape
        x = jnp.broadcast_to(f[:, :, None, :], (n, l, l, c))
        y = jnp.broadcast_to(f[:, None, :, :], (n, l, l, c))
        return jnp.concatenate([x, y], axis=3)

    n, l, _ = feat.shape
    feat = lin(feat, params['Wi'], params['bi'])
    feat_e = lin(outer_concat(feat), params['Wxf'], params['bxf'])
    feat_v = feat
    for _ in range(n_step):
        _e = lin(outer_concat(feat_v), params['Wxf'], params['bxf'])
        _e = jnp.concatenate([_e, feat_e], axis=3)
        feat_e = lin(_e, params['Wue'], params['bue'])

        hid = feat_v * mask[:, :, None]
        xhid = lin(hid, params['Wag'], params['bag'])
        aggs = []
        for j in range(l):
            attn = lin(feat_e[:, :, j, :], params['Wat'], params['bat'])
            w = jax.nn.softmax(attn, axis=1)
            s = jnp.sum(w * xhid, axis=1, keepdims=True)
            aggs.append(jax.nn.sigmoid(s))
        agg = jnp.concatenate(aggs, axis=1)
        xh = jnp.concatenate([xhid, agg], axis=2)
        feat_v = lin(xh, params['Wuv'], params['buv'])
    return lin(feat_v, params['Wo'], params['bo'])


if __name__ == "__main__":
    n, l, n_inp, n_inn, n_step = 2, 8, 16, 32, 3

    key = jax.random.PRNGKey(0)
    k_feat, k_mask, k_par = jax.random.split(key, 3)
    feat = jax.random.normal(k_feat, (n, l, n_inp), dtype=F32)
    mask = (jax.random.uniform(k_mask, (n, l)) > 0.25).astype(F32)
    params = init_params(k_par, n_inp, n_inn)

    fwd = jax.jit(pallas_forward, static_argnums=(3,))
    out = fwd(params, feat, mask, n_step)
    out = jax.block_until_ready(out)

    ref = ref_forward(params, feat, mask, n_step)

    assert out.shape == (n, l, n_inp), out.shape
    assert bool(jnp.all(jnp.isfinite(out)))
    max_err = float(jnp.max(jnp.abs(out - ref)))
    assert max_err < 2e-2, f"max abs err {max_err}"
    print("KERNEL_OK")
</pallas_src>

<mosaic_0001>
module attributes {stable_mosaic.version = 11 : i64} {
  func.func @_efgn_kernel(%arg0: i32, %arg1: memref<1x8x16xf32, #tpu.memory_space<vmem>>, %arg2: memref<1x8x1xf32, #tpu.memory_space<vmem>>, %arg3: memref<16x32xf32, #tpu.memory_space<vmem>>, %arg4: memref<1x32xf32, #tpu.memory_space<vmem>>, %arg5: memref<32x64xf32, #tpu.memory_space<vmem>>, %arg6: memref<1x64xf32, #tpu.memory_space<vmem>>, %arg7: memref<32x192xf32, #tpu.memory_space<vmem>>, %arg8: memref<1x192xf32, #tpu.memory_space<vmem>>, %arg9: memref<1x32xf32, #tpu.memory_space<vmem>>, %arg10: memref<32x64xf32, #tpu.memory_space<vmem>>, %arg11: memref<32x32xf32, #tpu.memory_space<vmem>>, %arg12: memref<1x32xf32, #tpu.memory_space<vmem>>, %arg13: memref<32x16xf32, #tpu.memory_space<vmem>>, %arg14: memref<1x16xf32, #tpu.memory_space<vmem>>, %arg15: memref<1x8x16xf32, #tpu.memory_space<vmem>>) attributes {dimension_semantics = [#tpu.dimension_semantics<parallel>], iteration_bounds = array<i64: 2>, scalar_prefetch = 0 : i64, scratch_operands = 0 : i64, tpu.core_type = #tpu.core_type<tc>, window_params = [{transform_indices = @transform_0, window_bounds = array<i64: 1, 8, 16>}, {transform_indices = @transform_1, window_bounds = array<i64: 1, 8, 1>}, {pipeline_mode = #tpu.pipeline_mode<synchronous>, transform_indices = @transform_2, window_bounds = array<i64: 16, 32>}, {pipeline_mode = #tpu.pipeline_mode<synchronous>, transform_indices = @transform_3, window_bounds = array<i64: 1, 32>}, {pipeline_mode = #tpu.pipeline_mode<synchronous>, transform_indices = @transform_4, window_bounds = array<i64: 32, 64>}, {pipeline_mode = #tpu.pipeline_mode<synchronous>, transform_indices = @transform_5, window_bounds = array<i64: 1, 64>}, {pipeline_mode = #tpu.pipeline_mode<synchronous>, transform_indices = @transform_6, window_bounds = array<i64: 32, 192>}, {pipeline_mode = #tpu.pipeline_mode<synchronous>, transform_indices = @transform_7, window_bounds = array<i64: 1, 192>}, {pipeline_mode = #tpu.pipeline_mode<synchronous>, transform_indices = @transform_8, window_bounds = array<i64: 1, 32>}, {pipeline_mode = #tpu.pipeline_mode<synchronous>, transform_indices = @transform_9, window_bounds = array<i64: 32, 64>}, {pipeline_mode = #tpu.pipeline_mode<synchronous>, transform_indices = @transform_10, window_bounds = array<i64: 32, 32>}, {pipeline_mode = #tpu.pipeline_mode<synchronous>, transform_indices = @transform_11, window_bounds = array<i64: 1, 32>}, {pipeline_mode = #tpu.pipeline_mode<synchronous>, transform_indices = @transform_12, window_bounds = array<i64: 32, 16>}, {pipeline_mode = #tpu.pipeline_mode<synchronous>, transform_indices = @transform_13, window_bounds = array<i64: 1, 16>}, {transform_indices = @transform_14, window_bounds = array<i64: 1, 8, 16>}]} {
    %c0 = arith.constant 0 : index
    %c0_0 = arith.constant 0 : index
    %c0_1 = arith.constant 0 : index
    %0 = vector.load %arg1[%c0, %c0_0, %c0_1] : memref<1x8x16xf32, #tpu.memory_space<vmem>>, vector<1x8x16xf32>
    %1 = vector.shape_cast %0 : vector<1x8x16xf32> to vector<8x16xf32>
    %c0_2 = arith.constant 0 : index
    %c0_3 = arith.constant 0 : index
    %c0_4 = arith.constant 0 : index
    %2 = vector.load %arg2[%c0_2, %c0_3, %c0_4] : memref<1x8x1xf32, #tpu.memory_space<vmem>>, vector<1x8x1xf32>
    %3 = vector.shape_cast %2 : vector<1x8x1xf32> to vector<8x1xf32>
    %c0_5 = arith.constant 0 : index
    %c0_6 = arith.constant 0 : index
    %4 = vector.load %arg8[%c0_5, %c0_6] : memref<1x192xf32, #tpu.memory_space<vmem>>, vector<1x192xf32>
    %5 = vector.shape_cast %4 : vector<1x192xf32> to vector<1x192xf32>
    %6 = vector.broadcast %5 : vector<1x192xf32> to vector<8x192xf32>
    %c0_7 = arith.constant 0 : index
    %c0_8 = arith.constant 0 : index
    %7 = vector.load %arg9[%c0_7, %c0_8] : memref<1x32xf32, #tpu.memory_space<vmem>>, vector<1x32xf32>
    %8 = vector.shape_cast %7 : vector<1x32xf32> to vector<1x32xf32>
    %9 = vector.broadcast %8 : vector<1x32xf32> to vector<8x32xf32>
    %c0_9 = arith.constant 0 : index
    %c0_10 = arith.constant 0 : index
    %10 = vector.load %arg12[%c0_9, %c0_10] : memref<1x32xf32, #tpu.memory_space<vmem>>, vector<1x32xf32>
    %11 = vector.shape_cast %10 : vector<1x32xf32> to vector<1x32xf32>
    %12 = vector.broadcast %11 : vector<1x32xf32> to vector<8x32xf32>
    %c0_11 = arith.constant 0 : index
    %c0_12 = arith.constant 0 : index
    %13 = vector.load %arg3[%c0_11, %c0_12] : memref<16x32xf32, #tpu.memory_space<vmem>>, vector<16x32xf32>
    %cst = arith.constant dense<0.000000e+00> : vector<8x32xf32>
    %14 = tpu.matmul %1, %13, %cst {dimension_numbers = #tpu.dot_dimension_numbers<[1], [0], [0], [1], [0, 0, 1, 1], [], []>} : vector<8x16xf32>, vector<16x32xf32>, vector<8x32xf32> -> vector<8x32xf32>
    %c0_13 = arith.constant 0 : index
    %c0_14 = arith.constant 0 : index
    %15 = vector.load %arg4[%c0_13, %c0_14] : memref<1x32xf32, #tpu.memory_space<vmem>>, vector<1x32xf32>
    %16 = vector.broadcast %15 : vector<1x32xf32> to vector<8x32xf32>
    %17 = arith.addf %14, %16 : vector<8x32xf32>
    %c0_15 = arith.constant 0 : index
    %c0_16 = arith.constant 0 : index
    %18 = vector.load %arg5[%c0_15, %c0_16] : memref<32x64xf32, #tpu.memory_space<vmem>>, vector<32x64xf32>
    %cst_17 = arith.constant dense<0.000000e+00> : vector<8x64xf32>
    %19 = tpu.matmul %17, %18, %cst_17 {dimension_numbers = #tpu.dot_dimension_numbers<[1], [0], [0], [1], [0, 0, 1, 1], [], []>} : vector<8x32xf32>, vector<32x64xf32>, vector<8x64xf32> -> vector<8x64xf32>
    %c0_18 = arith.constant 0 : index
    %c0_19 = arith.constant 0 : index
    %20 = vector.load %arg6[%c0_18, %c0_19] : memref<1x64xf32, #tpu.memory_space<vmem>>, vector<1x64xf32>
    %21 = vector.broadcast %20 : vector<1x64xf32> to vector<8x64xf32>
    %22 = arith.addf %19, %21 : vector<8x64xf32>
    %23 = vector.extract_strided_slice %22 {offsets = [0, 0], sizes = [8, 32], strides = [1, 1]} : vector<8x64xf32> to vector<8x32xf32>
    %24 = vector.extract_strided_slice %22 {offsets = [0, 32], sizes = [8, 32], strides = [1, 1]} : vector<8x64xf32> to vector<8x32xf32>
    %25 = vector.shape_cast %23 : vector<8x32xf32> to vector<8x1x32xf32>
    %26 = vector.shape_cast %24 : vector<8x32xf32> to vector<1x8x32xf32>
    %27 = vector.broadcast %25 : vector<8x1x32xf32> to vector<8x8x32xf32>
    %28 = vector.broadcast %26 : vector<1x8x32xf32> to vector<8x8x32xf32>
    %29 = arith.addf %27, %28 : vector<8x8x32xf32>
    %30 = vector.shape_cast %29 : vector<8x8x32xf32> to vector<64x32xf32>
    %c0_20 = arith.constant 0 : index
    %c0_21 = arith.constant 0 : index
    %31 = vector.load %arg10[%c0_20, %c0_21] : memref<32x64xf32, #tpu.memory_space<vmem>>, vector<32x64xf32>
    %cst_22 = arith.constant dense<0.000000e+00> : vector<64x64xf32>
    %32 = tpu.matmul %30, %31, %cst_22 {dimension_numbers = #tpu.dot_dimension_numbers<[1], [0], [0], [1], [0, 0, 1, 1], [], []>} : vector<64x32xf32>, vector<32x64xf32>, vector<64x64xf32> -> vector<64x64xf32>
    %33 = vector.extract_strided_slice %32 {offsets = [0, 0], sizes = [64, 32], strides = [1, 1]} : vector<64x64xf32> to vector<64x32xf32>
    %34 = vector.shape_cast %33 : vector<64x32xf32> to vector<8x8x32xf32>
    %35 = vector.extract_strided_slice %32 {offsets = [0, 32], sizes = [64, 32], strides = [1, 1]} : vector<64x64xf32> to vector<64x32xf32>
    %36 = vector.shape_cast %35 : vector<64x32xf32> to vector<8x8x32xf32>
    %c0_23 = arith.constant 0 : index
    %c0_24 = arith.constant 0 : index
    %37 = vector.load %arg7[%c0_23, %c0_24] : memref<32x192xf32, #tpu.memory_space<vmem>>, vector<32x192xf32>
    %cst_25 = arith.constant dense<0.000000e+00> : vector<8x192xf32>
    %38 = tpu.matmul %17, %37, %cst_25 {dimension_numbers = #tpu.dot_dimension_numbers<[1], [0], [0], [1], [0, 0, 1, 1], [], []>} : vector<8x32xf32>, vector<32x192xf32>, vector<8x192xf32> -> vector<8x192xf32>
    %39 = arith.addf %38, %6 : vector<8x192xf32>
    %40 = vector.extract_strided_slice %39 {offsets = [0, 0], sizes = [8, 32], strides = [1, 1]} : vector<8x192xf32> to vector<8x32xf32>
    %41 = vector.extract_strided_slice %39 {offsets = [0, 32], sizes = [8, 32], strides = [1, 1]} : vector<8x192xf32> to vector<8x32xf32>
    %42 = vector.extract_strided_slice %39 {offsets = [0, 64], sizes = [8, 32], strides = [1, 1]} : vector<8x192xf32> to vector<8x32xf32>
    %43 = vector.extract_strided_slice %39 {offsets = [0, 96], sizes = [8, 32], strides = [1, 1]} : vector<8x192xf32> to vector<8x32xf32>
    %44 = vector.extract_strided_slice %39 {offsets = [0, 128], sizes = [8, 32], strides = [1, 1]} : vector<8x192xf32> to vector<8x32xf32>
    %45 = vector.extract_strided_slice %39 {offsets = [0, 160], sizes = [8, 32], strides = [1, 1]} : vector<8x192xf32> to vector<8x32xf32>
    %46 = vector.shape_cast %40 : vector<8x32xf32> to vector<8x1x32xf32>
    %47 = vector.shape_cast %41 : vector<8x32xf32> to vector<1x8x32xf32>
    %48 = vector.broadcast %46 : vector<8x1x32xf32> to vector<8x8x32xf32>
    %49 = vector.broadcast %47 : vector<1x8x32xf32> to vector<8x8x32xf32>
    %50 = arith.addf %48, %49 : vector<8x8x32xf32>
    %51 = arith.addf %50, %34 : vector<8x8x32xf32>
    %52 = vector.shape_cast %44 : vector<8x32xf32> to vector<8x1x32xf32>
    %53 = vector.shape_cast %45 : vector<8x32xf32> to vector<1x8x32xf32>
    %54 = vector.broadcast %52 : vector<8x1x32xf32> to vector<8x8x32xf32>
    %55 = vector.broadcast %53 : vector<1x8x32xf32> to vector<8x8x32xf32>
    %56 = arith.addf %54, %55 : vector<8x8x32xf32>
    %57 = arith.addf %56, %36 : vector<8x8x32xf32>
    %58 = vector.broadcast %3 : vector<8x1xf32> to vector<8x32xf32>
    %59 = arith.mulf %58, %42 : vector<8x32xf32>
    %60 = arith.addf %59, %9 : vector<8x32xf32>
    %cst_26 = arith.constant dense<0xFF800000> : vector<8x32xf32>
    %61 = vector.multi_reduction <maximumf>, %57, %cst_26 [0] : vector<8x8x32xf32> to vector<8x32xf32>
    %62 = vector.shape_cast %61 : vector<8x32xf32> to vector<1x8x32xf32>
    %63 = vector.broadcast %62 : vector<1x8x32xf32> to vector<8x8x32xf32>
    %64 = arith.subf %57, %63 : vector<8x8x32xf32>
    %65 = math.exp %64 : vector<8x8x32xf32>
    %cst_27 = arith.constant dense<0.000000e+00> : vector<8x32xf32>
    %66 = vector.multi_reduction <add>, %65, %cst_27 [0] : vector<8x8x32xf32> to vector<8x32xf32>
    %67 = vector.shape_cast %60 : vector<8x32xf32> to vector<8x1x32xf32>
    %68 = vector.broadcast %67 : vector<8x1x32xf32> to vector<8x8x32xf32>
    %69 = arith.mulf %65, %68 : vector<8x8x32xf32>
    %cst_28 = arith.constant dense<0.000000e+00> : vector<8x32xf32>
    %70 = vector.multi_reduction <add>, %69, %cst_28 [0] : vector<8x8x32xf32> to vector<8x32xf32>
    %71 = tpu.reciprocal %66 {approx = true} : vector<8x32xf32> -> vector<8x32xf32>
    %72 = arith.mulf %70, %71 : vector<8x32xf32>
    %cst_29 = arith.constant 0.000000e+00 : f32
    %73 = vector.broadcast %cst_29 : f32 to vector<8x32xf32>
    %74 = arith.subf %73, %72 : vector<8x32xf32>
    %75 = math.exp %74 : vector<8x32xf32>
    %cst_30 = arith.constant 1.000000e+00 : f32
    %76 = vector.broadcast %cst_30 : f32 to vector<8x32xf32>
    %77 = arith.addf %76, %75 : vector<8x32xf32>
    %78 = tpu.reciprocal %77 {approx = true} : vector<8x32xf32> -> vector<8x32xf32>
    %79 = vector.broadcast %3 : vector<8x1xf32> to vector<8x32xf32>
    %80 = arith.mulf %79, %43 : vector<8x32xf32>
    %c0_31 = arith.constant 0 : index
    %c0_32 = arith.constant 0 : index
    %81 = vector.load %arg11[%c0_31, %c0_32] : memref<32x32xf32, #tpu.memory_space<vmem>>, vector<32x32xf32>
    %cst_33 = arith.constant dense<0.000000e+00> : vector<8x32xf32>
    %82 = tpu.matmul %78, %81, %cst_33 {dimension_numbers = #tpu.dot_dimension_numbers<[1], [0], [0], [1], [0, 0, 1, 1], [], []>} : vector<8x32xf32>, vector<32x32xf32>, vector<8x32xf32> -> vector<8x32xf32>
    %83 = arith.addf %80, %82 : vector<8x32xf32>
    %84 = arith.addf %83, %12 : vector<8x32xf32>
    %85 = vector.shape_cast %51 : vector<8x8x32xf32> to vector<64x32xf32>
    %c0_34 = arith.constant 0 : index
    %c0_35 = arith.constant 0 : index
    %86 = vector.load %arg10[%c0_34, %c0_35] : memref<32x64xf32, #tpu.memory_space<vmem>>, vector<32x64xf32>
    %cst_36 = arith.constant dense<0.000000e+00> : vector<64x64xf32>
    %87 = tpu.matmul %85, %86, %cst_36 {dimension_numbers = #tpu.dot_dimension_numbers<[1], [0], [0], [1], [0, 0, 1, 1], [], []>} : vector<64x32xf32>, vector<32x64xf32>, vector<64x64xf32> -> vector<64x64xf32>
    %88 = vector.extract_strided_slice %87 {offsets = [0, 0], sizes = [64, 32], strides = [1, 1]} : vector<64x64xf32> to vector<64x32xf32>
    %89 = vector.shape_cast %88 : vector<64x32xf32> to vector<8x8x32xf32>
    %90 = vector.extract_strided_slice %87 {offsets = [0, 32], sizes = [64, 32], strides = [1, 1]} : vector<64x64xf32> to vector<64x32xf32>
    %91 = vector.shape_cast %90 : vector<64x32xf32> to vector<8x8x32xf32>
    %c0_37 = arith.constant 0 : index
    %c0_38 = arith.constant 0 : index
    %92 = vector.load %arg7[%c0_37, %c0_38] : memref<32x192xf32, #tpu.memory_space<vmem>>, vector<32x192xf32>
    %cst_39 = arith.constant dense<0.000000e+00> : vector<8x192xf32>
    %93 = tpu.matmul %84, %92, %cst_39 {dimension_numbers = #tpu.dot_dimension_numbers<[1], [0], [0], [1], [0, 0, 1, 1], [], []>} : vector<8x32xf32>, vector<32x192xf32>, vector<8x192xf32> -> vector<8x192xf32>
    %94 = arith.addf %93, %6 : vector<8x192xf32>
    %95 = vector.extract_strided_slice %94 {offsets = [0, 0], sizes = [8, 32], strides = [1, 1]} : vector<8x192xf32> to vector<8x32xf32>
    %96 = vector.extract_strided_slice %94 {offsets = [0, 32], sizes = [8, 32], strides = [1, 1]} : vector<8x192xf32> to vector<8x32xf32>
    %97 = vector.extract_strided_slice %94 {offsets = [0, 64], sizes = [8, 32], strides = [1, 1]} : vector<8x192xf32> to vector<8x32xf32>
    %98 = vector.extract_strided_slice %94 {offsets = [0, 96], sizes = [8, 32], strides = [1, 1]} : vector<8x192xf32> to vector<8x32xf32>
    %99 = vector.extract_strided_slice %94 {offsets = [0, 128], sizes = [8, 32], strides = [1, 1]} : vector<8x192xf32> to vector<8x32xf32>
    %100 = vector.extract_strided_slice %94 {offsets = [0, 160], sizes = [8, 32], strides = [1, 1]} : vector<8x192xf32> to vector<8x32xf32>
    %101 = vector.shape_cast %95 : vector<8x32xf32> to vector<8x1x32xf32>
    %102 = vector.shape_cast %96 : vector<8x32xf32> to vector<1x8x32xf32>
    %103 = vector.broadcast %101 : vector<8x1x32xf32> to vector<8x8x32xf32>
    %104 = vector.broadcast %102 : vector<1x8x32xf32> to vector<8x8x32xf32>
    %105 = arith.addf %103, %104 : vector<8x8x32xf32>
    %106 = arith.addf %105, %89 : vector<8x8x32xf32>
    %107 = vector.shape_cast %99 : vector<8x32xf32> to vector<8x1x32xf32>
    %108 = vector.shape_cast %100 : vector<8x32xf32> to vector<1x8x32xf32>
    %109 = vector.broadcast %107 : vector<8x1x32xf32> to vector<8x8x32xf32>
    %110 = vector.broadcast %108 : vector<1x8x32xf32> to vector<8x8x32xf32>
    %111 = arith.addf %109, %110 : vector<8x8x32xf32>
    %112 = arith.addf %111, %91 : vector<8x8x32xf32>
    %113 = vector.broadcast %3 : vector<8x1xf32> to vector<8x32xf32>
    %114 = arith.mulf %113, %97 : vector<8x32xf32>
    %115 = arith.addf %114, %9 : vector<8x32xf32>
    %cst_40 = arith.constant dense<0xFF800000> : vector<8x32xf32>
    %116 = vector.multi_reduction <maximumf>, %112, %cst_40 [0] : vector<8x8x32xf32> to vector<8x32xf32>
    %117 = vector.shape_cast %116 : vector<8x32xf32> to vector<1x8x32xf32>
    %118 = vector.broadcast %117 : vector<1x8x32xf32> to vector<8x8x32xf32>
    %119 = arith.subf %112, %118 : vector<8x8x32xf32>
    %120 = math.exp %119 : vector<8x8x32xf32>
    %cst_41 = arith.constant dense<0.000000e+00> : vector<8x32xf32>
    %121 = vector.multi_reduction <add>, %120, %cst_41 [0] : vector<8x8x32xf32> to vector<8x32xf32>
    %122 = vector.shape_cast %115 : vector<8x32xf32> to vector<8x1x32xf32>
    %123 = vector.broadcast %122 : vector<8x1x32xf32> to vector<8x8x32xf32>
    %124 = arith.mulf %120, %123 : vector<8x8x32xf32>
    %cst_42 = arith.constant dense<0.000000e+00> : vector<8x32xf32>
    %125 = vector.multi_reduction <add>, %124, %cst_42 [0] : vector<8x8x32xf32> to vector<8x32xf32>
    %126 = tpu.reciprocal %121 {approx = true} : vector<8x32xf32> -> vector<8x32xf32>
    %127 = arith.mulf %125, %126 : vector<8x32xf32>
    %cst_43 = arith.constant 0.000000e+00 : f32
    %128 = vector.broadcast %cst_43 : f32 to vector<8x32xf32>
    %129 = arith.subf %128, %127 : vector<8x32xf32>
    %130 = math.exp %129 : vector<8x32xf32>
    %cst_44 = arith.constant 1.000000e+00 : f32
    %131 = vector.broadcast %cst_44 : f32 to vector<8x32xf32>
    %132 = arith.addf %131, %130 : vector<8x32xf32>
    %133 = tpu.reciprocal %132 {approx = true} : vector<8x32xf32> -> vector<8x32xf32>
    %134 = vector.broadcast %3 : vector<8x1xf32> to vector<8x32xf32>
    %135 = arith.mulf %134, %98 : vector<8x32xf32>
    %c0_45 = arith.constant 0 : index
    %c0_46 = arith.constant 0 : index
    %136 = vector.load %arg11[%c0_45, %c0_46] : memref<32x32xf32, #tpu.memory_space<vmem>>, vector<32x32xf32>
    %cst_47 = arith.constant dense<0.000000e+00> : vector<8x32xf32>
    %137 = tpu.matmul %133, %136, %cst_47 {dimension_numbers = #tpu.dot_dimension_numbers<[1], [0], [0], [1], [0, 0, 1, 1], [], []>} : vector<8x32xf32>, vector<32x32xf32>, vector<8x32xf32> -> vector<8x32xf32>
    %138 = arith.addf %135, %137 : vector<8x32xf32>
    %139 = arith.addf %138, %12 : vector<8x32xf32>
    %140 = vector.shape_cast %106 : vector<8x8x32xf32> to vector<64x32xf32>
    %c0_48 = arith.constant 0 : index
    %c0_49 = arith.constant 0 : index
    %141 = vector.load %arg10[%c0_48, %c0_49] : memref<32x64xf32, #tpu.memory_space<vmem>>, vector<32x64xf32>
    %cst_50 = arith.constant dense<0.000000e+00> : vector<64x64xf32>
    %142 = tpu.matmul %140, %141, %cst_50 {dimension_numbers = #tpu.dot_dimension_numbers<[1], [0], [0], [1], [0, 0, 1, 1], [], []>} : vector<64x32xf32>, vector<32x64xf32>, vector<64x64xf32> -> vector<64x64xf32>
    %143 = vector.extract_strided_slice %142 {offsets = [0, 32], sizes = [64, 32], strides = [1, 1]} : vector<64x64xf32> to vector<64x32xf32>
    %144 = vector.shape_cast %143 : vector<64x32xf32> to vector<8x8x32xf32>
    %c0_51 = arith.constant 0 : index
    %c0_52 = arith.constant 0 : index
    %145 = vector.load %arg7[%c0_51, %c0_52] : memref<32x192xf32, #tpu.memory_space<vmem>>, vector<32x192xf32>
    %cst_53 = arith.constant dense<0.000000e+00> : vector<8x192xf32>
    %146 = tpu.matmul %139, %145, %cst_53 {dimension_numbers = #tpu.dot_dimension_numbers<[1], [0], [0], [1], [0, 0, 1, 1], [], []>} : vector<8x32xf32>, vector<32x192xf32>, vector<8x192xf32> -> vector<8x192xf32>
    %147 = arith.addf %146, %6 : vector<8x192xf32>
    %148 = vector.extract_strided_slice %147 {offsets = [0, 64], sizes = [8, 32], strides = [1, 1]} : vector<8x192xf32> to vector<8x32xf32>
    %149 = vector.extract_strided_slice %147 {offsets = [0, 96], sizes = [8, 32], strides = [1, 1]} : vector<8x192xf32> to vector<8x32xf32>
    %150 = vector.extract_strided_slice %147 {offsets = [0, 128], sizes = [8, 32], strides = [1, 1]} : vector<8x192xf32> to vector<8x32xf32>
    %151 = vector.extract_strided_slice %147 {offsets = [0, 160], sizes = [8, 32], strides = [1, 1]} : vector<8x192xf32> to vector<8x32xf32>
    %152 = vector.shape_cast %150 : vector<8x32xf32> to vector<8x1x32xf32>
    %153 = vector.shape_cast %151 : vector<8x32xf32> to vector<1x8x32xf32>
    %154 = vector.broadcast %152 : vector<8x1x32xf32> to vector<8x8x32xf32>
    %155 = vector.broadcast %153 : vector<1x8x32xf32> to vector<8x8x32xf32>
    %156 = arith.addf %154, %155 : vector<8x8x32xf32>
    %157 = arith.addf %156, %144 : vector<8x8x32xf32>
    %158 = vector.broadcast %3 : vector<8x1xf32> to vector<8x32xf32>
    %159 = arith.mulf %158, %148 : vector<8x32xf32>
    %160 = arith.addf %159, %9 : vector<8x32xf32>
    %cst_54 = arith.constant dense<0xFF800000> : vector<8x32xf32>
    %161 = vector.multi_reduction <maximumf>, %157, %cst_54 [0] : vector<8x8x32xf32> to vector<8x32xf32>
    %162 = vector.shape_cast %161 : vector<8x32xf32> to vector<1x8x32xf32>
    %163 = vector.broadcast %162 : vector<1x8x32xf32> to vector<8x8x32xf32>
    %164 = arith.subf %157, %163 : vector<8x8x32xf32>
    %165 = math.exp %164 : vector<8x8x32xf32>
    %cst_55 = arith.constant dense<0.000000e+00> : vector<8x32xf32>
    %166 = vector.multi_reduction <add>, %165, %cst_55 [0] : vector<8x8x32xf32> to vector<8x32xf32>
    %167 = vector.shape_cast %160 : vector<8x32xf32> to vector<8x1x32xf32>
    %168 = vector.broadcast %167 : vector<8x1x32xf32> to vector<8x8x32xf32>
    %169 = arith.mulf %165, %168 : vector<8x8x32xf32>
    %cst_56 = arith.constant dense<0.000000e+00> : vector<8x32xf32>
    %170 = vector.multi_reduction <add>, %169, %cst_56 [0] : vector<8x8x32xf32> to vector<8x32xf32>
    %171 = tpu.reciprocal %166 {approx = true} : vector<8x32xf32> -> vector<8x32xf32>
    %172 = arith.mulf %170, %171 : vector<8x32xf32>
    %cst_57 = arith.constant 0.000000e+00 : f32
    %173 = vector.broadcast %cst_57 : f32 to vector<8x32xf32>
    %174 = arith.subf %173, %172 : vector<8x32xf32>
    %175 = math.exp %174 : vector<8x32xf32>
    %cst_58 = arith.constant 1.000000e+00 : f32
    %176 = vector.broadcast %cst_58 : f32 to vector<8x32xf32>
    %177 = arith.addf %176, %175 : vector<8x32xf32>
    %178 = tpu.reciprocal %177 {approx = true} : vector<8x32xf32> -> vector<8x32xf32>
    %179 = vector.broadcast %3 : vector<8x1xf32> to vector<8x32xf32>
    %180 = arith.mulf %179, %149 : vector<8x32xf32>
    %c0_59 = arith.constant 0 : index
    %c0_60 = arith.constant 0 : index
    %181 = vector.load %arg11[%c0_59, %c0_60] : memref<32x32xf32, #tpu.memory_space<vmem>>, vector<32x32xf32>
    %cst_61 = arith.constant dense<0.000000e+00> : vector<8x32xf32>
    %182 = tpu.matmul %178, %181, %cst_61 {dimension_numbers = #tpu.dot_dimension_numbers<[1], [0], [0], [1], [0, 0, 1, 1], [], []>} : vector<8x32xf32>, vector<32x32xf32>, vector<8x32xf32> -> vector<8x32xf32>
    %183 = arith.addf %180, %182 : vector<8x32xf32>
    %184 = arith.addf %183, %12 : vector<8x32xf32>
    %c0_62 = arith.constant 0 : index
    %c0_63 = arith.constant 0 : index
    %185 = vector.load %arg13[%c0_62, %c0_63] : memref<32x16xf32, #tpu.memory_space<vmem>>, vector<32x16xf32>
    %cst_64 = arith.constant dense<0.000000e+00> : vector<8x16xf32>
    %186 = tpu.matmul %184, %185, %cst_64 {dimension_numbers = #tpu.dot_dimension_numbers<[1], [0], [0], [1], [0, 0, 1, 1], [], []>} : vector<8x32xf32>, vector<32x16xf32>, vector<8x16xf32> -> vector<8x16xf32>
    %c0_65 = arith.constant 0 : index
    %c0_66 = arith.constant 0 : index
    %187 = vector.load %arg14[%c0_65, %c0_66] : memref<1x16xf32, #tpu.memory_space<vmem>>, vector<1x16xf32>
    %188 = vector.broadcast %187 : vector<1x16xf32> to vector<8x16xf32>
    %189 = arith.addf %186, %188 : vector<8x16xf32>
    %c0_67 = arith.constant 0 : index
    %c0_68 = arith.constant 0 : index
    %c0_69 = arith.constant 0 : index
    %190 = vector.load %arg15[%c0_67, %c0_68, %c0_69] : memref<1x8x16xf32, #tpu.memory_space<vmem>>, vector<1x8x16xf32>
    %191 = vector.shape_cast %190 : vector<1x8x16xf32> to vector<8x16xf32>
    %192 = vector.shape_cast %189 : vector<8x16xf32> to vector<1x8x16xf32>
    tpu.vector_store %arg15[%c0_67, %c0_68, %c0_69], %192 {strides = array<i32>} : memref<1x8x16xf32, #tpu.memory_space<vmem>>, vector<1x8x16xf32>,
    return
  }
  func.func @transform_0(%arg0: i32) -> (i32, i32, i32) {
    %c0_i32 = arith.constant 0 : i32
    %c0_i32_0 = arith.constant 0 : i32
    %c0_i32_1 = arith.constant 0 : i32
    return %arg0, %c0_i32, %c0_i32_0 : i32, i32, i32
  }
  func.func @transform_1(%arg0: i32) -> (i32, i32, i32) {
    %c0_i32 = arith.constant 0 : i32
    %c0_i32_0 = arith.constant 0 : i32
    %c0_i32_1 = arith.constant 0 : i32
    return %arg0, %c0_i32, %c0_i32_0 : i32, i32, i32
  }
  func.func @transform_2(%arg0: i32) -> (i32, i32) {
    %c0_i32 = arith.constant 0 : i32
    %c0_i32_0 = arith.constant 0 : i32
    %c0_i32_1 = arith.constant 0 : i32
    return %c0_i32, %c0_i32_0 : i32, i32
  }
  func.func @transform_3(%arg0: i32) -> (i32, i32) {
    %c0_i32 = arith.constant 0 : i32
    %c0_i32_0 = arith.constant 0 : i32
    %c0_i32_1 = arith.constant 0 : i32
    return %c0_i32, %c0_i32_0 : i32, i32
  }
  func.func @transform_4(%arg0: i32) -> (i32, i32) {
    %c0_i32 = arith.constant 0 : i32
    %c0_i32_0 = arith.constant 0 : i32
    %c0_i32_1 = arith.constant 0 : i32
    return %c0_i32, %c0_i32_0 : i32, i32
  }
  func.func @transform_5(%arg0: i32) -> (i32, i32) {
    %c0_i32 = arith.constant 0 : i32
    %c0_i32_0 = arith.constant 0 : i32
    %c0_i32_1 = arith.constant 0 : i32
    return %c0_i32, %c0_i32_0 : i32, i32
  }
  func.func @transform_6(%arg0: i32) -> (i32, i32) {
    %c0_i32 = arith.constant 0 : i32
    %c0_i32_0 = arith.constant 0 : i32
    %c0_i32_1 = arith.constant 0 : i32
    return %c0_i32, %c0_i32_0 : i32, i32
  }
  func.func @transform_7(%arg0: i32) -> (i32, i32) {
    %c0_i32 = arith.constant 0 : i32
    %c0_i32_0 = arith.constant 0 : i32
    %c0_i32_1 = arith.constant 0 : i32
    return %c0_i32, %c0_i32_0 : i32, i32
  }
  func.func @transform_8(%arg0: i32) -> (i32, i32) {
    %c0_i32 = arith.constant 0 : i32
    %c0_i32_0 = arith.constant 0 : i32
    %c0_i32_1 = arith.constant 0 : i32
    return %c0_i32, %c0_i32_0 : i32, i32
  }
  func.func @transform_9(%arg0: i32) -> (i32, i32) {
    %c0_i32 = arith.constant 0 : i32
    %c0_i32_0 = arith.constant 0 : i32
    %c0_i32_1 = arith.constant 0 : i32
    return %c0_i32, %c0_i32_0 : i32, i32
  }
  func.func @transform_10(%arg0: i32) -> (i32, i32) {
    %c0_i32 = arith.constant 0 : i32
    %c0_i32_0 = arith.constant 0 : i32
    %c0_i32_1 = arith.constant 0 : i32
    return %c0_i32, %c0_i32_0 : i32, i32
  }
  func.func @transform_11(%arg0: i32) -> (i32, i32) {
    %c0_i32 = arith.constant 0 : i32
    %c0_i32_0 = arith.constant 0 : i32
    %c0_i32_1 = arith.constant 0 : i32
    return %c0_i32, %c0_i32_0 : i32, i32
  }
  func.func @transform_12(%arg0: i32) -> (i32, i32) {
    %c0_i32 = arith.constant 0 : i32
    %c0_i32_0 = arith.constant 0 : i32
    %c0_i32_1 = arith.constant 0 : i32
    return %c0_i32, %c0_i32_0 : i32, i32
  }
  func.func @transform_13(%arg0: i32) -> (i32, i32) {
    %c0_i32 = arith.constant 0 : i32
    %c0_i32_0 = arith.constant 0 : i32
    %c0_i32_1 = arith.constant 0 : i32
    return %c0_i32, %c0_i32_0 : i32, i32
  }
  func.func @transform_14(%arg0: i32) -> (i32, i32, i32) {
    %c0_i32 = arith.constant 0 : i32
    %c0_i32_0 = arith.constant 0 : i32
    %c0_i32_1 = arith.constant 0 : i32
    return %arg0, %c0_i32, %c0_i32_0 : i32, i32, i32
  }
}

</mosaic_0001>

<bundles_post_ra>
// kernel: pallas_forward.1
= control target key start
LH: loop header
LB: loop body
LE: loop exit
PB: predicated region body
PF: predicated region fallthrough
CT: control target
= control target key end

     0   :  { %s4320_s0 = inlined_call_operand.vmem [shape: f32[2,8,16], index: 0, kind: input, shape index: {}]   ;;  %s4321_s1 = inlined_call_operand.vmem [shape: f32[2,8,1], index: 1, kind: input, shape index: {}]   ;;  %s4322_s2 = inlined_call_operand.vmem [shape: f32[16,32], index: 2, kind: input, shape index: {}]   ;;  %s4323_s3 = inlined_call_operand.vmem [shape: f32[1,32], index: 3, kind: input, shape index: {}]   ;;  %s4324_s4 = inlined_call_operand.vmem [shape: f32[32,64], index: 4, kind: input, shape index: {}]   ;;  %s4325_s5 = inlined_call_operand.vmem [shape: f32[1,64], index: 5, kind: input, shape index: {}]   ;;  %s4326_s6 = inlined_call_operand.vmem [shape: f32[32,192], index: 6, kind: input, shape index: {}]   ;;  %s4327_s7 = inlined_call_operand.vmem [shape: f32[1,192], index: 7, kind: input, shape index: {}]   ;;  %s4328_s8 = inlined_call_operand.vmem [shape: f32[1,32], index: 8, kind: input, shape index: {}]   ;;  %s4329_s9 = inlined_call_operand.vmem [shape: f32[32,64], index: 9, kind: input, shape index: {}]   ;;  %s4330_s10 = inlined_call_operand.vmem [shape: f32[32,32], index: 10, kind: input, shape index: {}]   ;;  %s4331_s11 = inlined_call_operand.vmem [shape: f32[1,32], index: 11, kind: input, shape index: {}]   ;;  %s4332_s12 = inlined_call_operand.vmem [shape: f32[32,16], index: 12, kind: input, shape index: {}]   ;;  %s4333_s13 = inlined_call_operand.vmem [shape: f32[1,16], index: 13, kind: input, shape index: {}]   ;;  %s4334_s14 = inlined_call_operand.hbm [shape: f32[2,8,16], index: 14, kind: output, shape index: {}]  }
   0x1   :  { %4336 = sst [smem:[#allocation6_spill]] %s4320_s0 }
   0x2   :  { %4337 = sst [smem:[#allocation7_spill]] %s4322_s2 }
   0x3   :  { %4338 = sst [smem:[#allocation8_spill]] %s4324_s4 }
   0x4   :  { %19 = vsyncpa [#allocation3], 0 }
   0x5   :  { %21 = vsyncpa [#allocation3 + $0x1], 0  ;;  %s3616_s29 = smov 0   ;;  %s3618_s30 = smov 0  }
   0x6   :  { %s3620_s15 = smov 0   ;;  %s3622_s16 = smov 0  }
   0x7 LB: > { %s3637_s17 = sadd.s32 4294967295, %s3530_s16   ;;  %s3038_s18 = sadd.s32 4294967294, %s3530_s16   ;;  %s3530_s16 = sphi %s3622_s16, %s4350_s16   ;;  %s3526_s15 = sphi %s3620_s15, %s4349_s15   ;;  %s3522_s30 = sphi %s3618_s30, %s4348_s30   ;;  %s3518_s29 = sphi %s3616_s29, %s4347_s29  }
   0x8   : > { %s3641_s19 = sadd.s32 1, %s3530_s16   ;;  %s338_s20 = sadd.s32 1, %s3526_s15 }
   0x9   : > { %s335_s21 = ssub.s32 %s3530_s16, %s3641_s19  ;;  %p348_p0 = scmp.ne.s32.totalorder %s3526_s15, %s3522_s30 }
   0xa   : > { %p336_p1 = scmp.eq.s32.totalorder %s335_s21, 0  ;;  %p349_p2 = scmp.eq.s32.totalorder %s3637_s17, 1 }
   0xb   : > { %p354_p3 = scmp.ne.s32.totalorder %s3522_s30, %s3518_s29  ;;  %p355_p4 = scmp.eq.s32.totalorder %s3038_s18, 1 }
   0xc   : > { %s3652_s22 = scalar_select %p336_p1, %s3526_s15, %s338_s20  }
   0xd   : > { %p3654_p5 = por %p349_p2, %p348_p0  ;;  %p3658_p6 = por %p355_p4, %p354_p3 }
   0xe   : > { %4339 = sst [smem:[#allocation5_spill]] %s3652_s22  ;;  %p3041_p7 = scmp.ge.s32.totalorder %s3530_s16, 1 }
   0xf   : > { %p423_p8 = scmp.lt.s32.totalorder %s3530_s16, 3 }
  0x11   : > { %p424_p9 = pnand %p3041_p7, %p423_p8 }
  0x12   : > { %s4342_s2 = sld [smem:[#allocation7_spill]] (!%p424_p9)  ;;  %p472_p10 = scmp.lt.s32.totalorder (!%p424_p9), %s3637_s17, 1  ;;  %v3532_v2 = vmov (!%p424_p9), 0.0|0.0   ;;  %vm3533_vm0 = vmmov (!%p424_p9), 0   ;;  %v3534_v4 = vmov (!%p424_p9), 0.0   ;;  %vm515_vm1 = vcmask (!%p424_p9), 130048  }
  0x13   : > { %427 = sbr.rel (%p424_p9) target bundleno = 3396 (0xd44), region = 76  ;;  %3273 = vmatprep.subr.bf16.mxu0 (!%p424_p9), %v3532_v2  ;;  %3155 = vmatprep.mubr.msk.f32.mxu0 (!%p424_p9), %vm3533_vm0, %v3534_v4  ;;  %s4343_s4 = sld [smem:[#allocation8_spill]] (!%p424_p9)  ;;  %v909_v12 = vld [vmem:[%s4326_s6 + $0x8] sm:$0xff] (!%p424_p9)  ;;  %v911_v13 = vld [vmem:[%s4326_s6 + $0x18] sm:$0xff] (!%p424_p9)  ;;  %v908_v15 = vld [vmem:[%s4326_s6] sm:$0xff] (!%p424_p9)  ;;  %vm600_vm2 = vcmask (!%p424_p9), 261120   ;;  %v484_v36 = vlaneseq (!%p424_p9) }
  0x14   : > { %3276 = vmatprep.subr.bf16.mxu1 (!%p424_p9), %v3532_v2  ;;  %3166 = vmatprep.mubr.msk.f32.mxu1 (!%p424_p9), %vm3533_vm0, %v3534_v4  ;;  %s4344_s0 = sld [smem:[#allocation6_spill]] (!%p424_p9)  ;;  %v3706_v14 = vpack.c.bf16 (!%p424_p9), %v911_v13, %v909_v12  ;;  %v910_v16 = vld [vmem:[%s4326_s6 + $0x10] sm:$0xff] (!%p424_p9)  ;;  %v3047_v17 = vld [vmem:[%s4323_s3] ss:$0 sm:$0xff] (!%p424_p9)  ;;  %v913_v18 = vld [vmem:[%s4326_s6 + $0x28] sm:$0xff] (!%p424_p9)  ;;  %v3535_v28 = vmov (!%p424_p9), 0  }
  0x15   : > { %v915_v19 = vld [vmem:[%s4326_s6 + $0x38] sm:$0xff] (!%p424_p9)  ;;  %v3724_v21 = vpack.c.bf16 (!%p424_p9), %v910_v16, %v908_v15  ;;  %v912_v25 = vld [vmem:[%s4326_s6 + $0x20] sm:$0xff] (!%p424_p9)  ;;  %v914_v26 = vld [vmem:[%s4326_s6 + $0x30] sm:$0xff] (!%p424_p9)  ;;  %3401 = vset.pattern.permute.xlu0 (!%p424_p9), %v3535_v28  ;;  %v485_v38 = vshrl.u32 (!%p424_p9), %v484_v36, 7  ;;  %v3538_v49 = vmov (!%p424_p9), 1966171168  }
  0x16   : > { %v3726_v24 = vpack.c.bf16 (!%p424_p9), %v915_v19, %v913_v18  ;;  %v3736_v27 = vpack.c.bf16 (!%p424_p9), %v914_v26, %v912_v25  ;;  %v3045_v29 = vld [vmem:[%s4328_s8] ss:$0 sm:$0xff] (!%p424_p9)  ;;  %v776_v31 = vld [vmem:[%s4329_s9 + $0x8] sm:$0xff] (!%p424_p9)  ;;  %v777_v32 = vld [vmem:[%s4329_s9 + $0x10] sm:$0xff] (!%p424_p9)  ;;  %v677_v50 = vunpack.c.l.s4 (!%p424_p9), %v3538_v49  ;;  %s3084_s27 = sshll.u32 (!%p424_p9), %s3637_s17, 7 }
  0x17   : > { %v775_v30 = vld [vmem:[%s4329_s9] sm:$0xff] (!%p424_p9)  ;;  %v778_v34 = vld [vmem:[%s4329_s9 + $0x18] sm:$0xff] (!%p424_p9)  ;;  %v490_v42 = vsub.s32 (!%p424_p9), 1, %v485_v38  ;;  %v3793_v57 = vsub.s32 (!%p424_p9), 0, %v485_v38 }
  0x18   : > { %v506_v0 = vld [vmem:[%s4342_s2] sm:$0xff] (!%p424_p9)  ;;  %v507_v1 = vld [vmem:[%s4342_s2 + $0x8] sm:$0xff] (!%p424_p9)  ;;  %s3536_s2 = smov (!%p424_p9), 64   ;;  %v3758_v33 = vpack.c.bf16 (!%p424_p9), %v776_v31, %v775_v30  ;;  %v3763_v35 = vpack.c.bf16 (!%p424_p9), %v778_v34, %v777_v32  ;;  %v678_v51 = vunpack.c.0.s8 (!%p424_p9), %v677_v50 }
  0x19   : > { %v3274_v3 = vpack.c.bf16 (!%p424_p9), %v507_v1, %v506_v0  ;;  %v589_v5 = vld [vmem:[%s4343_s4] sm:$0xff] (!%p424_p9)  ;;  %v590_v6 = vld [vmem:[%s4343_s4 + $0x8] sm:$0xff] (!%p424_p9)  ;;  %v591_v7 = vld [vmem:[%s4343_s4 + $0x10] sm:$0xff] (!%p424_p9)  ;;  %1243 = vrot.lane.b32.xlu1 (!%p424_p9), %v3045_v29, %s3536_s2 }
  0x1a   : > { %s3684_s28 = scalar_select %p472_p10, %s3637_s17, 1  ;;  %v3277_v8 = vpack.c.bf16 %v590_v6, %v589_v5  ;;  %v592_v9 = vld [vmem:[%s4343_s4 + $0x18] sm:$0xff]  ;;  %v3049_v37 = vld [vmem:[%s4325_s5] ss:$0 sm:$0xff]  ;;  %v3789_v52 = vsub.s32 %v678_v51, %v485_v38 }
  0x1b   : > { %3275 = vmatpush3.bf16.msra.mxu0 %v3274_v3  ;;  %v3280_v10 = vpack.c.bf16 %v592_v9, %v591_v7  ;;  %v482_v43 = vld [vmem:[%s4327_s7] sm:$0x3]  ;;  %s3540_s17 = smov [#allocation2]  }
  0x1c   : > { %s4335_s18 = sshll.u32 %s3684_s28, 3  ;;  %3278 = vmatpush3.bf16.msra.mxu1 %v3277_v8  ;;  %3283 = vmatprep.subr.bf16.mxu0 %v3758_v33  ;;  %s4345_s26 = sshll.u32 %s3684_s28, 3  ;;  %v3782_v45 = vrot.slane %v482_v43, %v490_v42  ;;  %v3820_v25 = vrot.slane %v482_v43, %v3793_v57 }
  0x1d   : > { %s475_s25 = scalar_lea.vmem %s4344_s0, %s4335_s18  ;;  %3279 = vmatprep.subr.bf16.mxu1 %v3532_v2  ;;  %s479_s20 = scalar_lea.vmem %s4321_s1, %s4345_s26 }
  0x1e   : > { %v480_v11 = vld [vmem:[%s475_s25] sm:$0xff]  ;;  %s3537_s0 = smov 96   ;;  %s3539_s25 = smov 32  }
  0x1f   : > { %3156 = vmatmul.mubr.msk.f32.vlgmr.msra.gmra.mrb[0].mxu0 %vm515_vm1, %v480_v11  ;;  %v481_v44 = vld [vmem:[%s479_s20] sm:$0xff]  ;;  %s469_s28 = sand.u32 1, %s3522_s30  }
  0x20   : > { %3281 = vmatpush3.bf16.msra.mxu1 %v3280_v10  ;;  %3285 = vmatpush3.bf16.msra.mxu0 %v3758_v33  ;;  %s2954_s21 = scalar_lea.sflag [#allocation3], %s469_s28 }
  0x21   : > { %3291 = vmatprep.subr.bf16.mxu1 %v3706_v14  ;;  %3287 = vmatprep.subr.bf16.mxu0 %v3763_v35 }
  0x24   : > { %3289 = vmatpush3.bf16.msra.mxu0 %v3763_v35 }
  0x25   : > { %3305 = vmatprep.subr.bf16.mxu0 %v3758_v33 }
  0x8b   : > { %v3831_v30 = vpop.permute.xlu1 %1243 }
  0xf2   : > { %v585_v20 = vpop.f32.mrb[0].mxu0 }
  0xf3   : > { %v586_v22 = vadd.f32 %v3047_v17, %v585_v20  ;;  %v3157_v23 = vpop.f32.mrb[1].mxu0 }
  0xf5   : > { %3167 = vmatmul.mubr.msk.f32.vlgmr.msra.gmra.mrb[0].mxu1 %vm600_vm2, %v586_v22 }
  0xf6   : > { %3293 = vmatpush1.bf16.msra.mxu1 %v3724_v21  ;;  %980 = vmatprep.mubr.f32.mxu1 %v3534_v4 }
  0xf7   : > { %3295 = vmatprep.subr.bf16.mxu1 %v3726_v24 }
  0xfa   : > { %3297 = vmatpush1.bf16.msra.mxu1 %v3736_v27 }
  0xfb   : > { %3298 = vmatprep.subr.bf16.mxu1 %v3532_v2 }
  0xfd   : > { %3059 = vmatmul.mubr.msk.f32.vlgmr.msra.gmra.mrb[2].mxu1 %vm600_vm2, %v586_v22 }
  0xfe   : > { %3197 = vmatprep.mubr.msk.f32.mxu1 %vm3533_vm0, %v3534_v4 }
 0x1c8   : > { %v670_v39 = vpop.f32.mrb[0].mxu1 }
 0x1c9   : > { %v671_v40 = vadd.f32 %v3049_v37, %v670_v39  ;;  %v3168_v41 = vpop.f32.mrb[1].mxu1 }
 0x1cb   : > { %764 = vrot.lane.b32.xlu0 %v671_v40, %s3537_s0  ;;  %v682_v53 = vrot.slane %v671_v40, %v3789_v52  ;;  %v675_v55 = vcombine.high %v671_v40, %v671_v40 }
 0x1cd   : > { %v690_v54 = vcombine.high %v682_v53, %v682_v53  ;;  %v698_v56 = vrot.slane %v682_v53, %v3789_v52  ;;  %v689_v59 = vrot.slane %v675_v55, %v3789_v52 }
 0x1cf   : > { %1239 = vperm.xlu0 %3401, %v481_v44   ;;  %v712_v58 = vrot.slane %v690_v54, %v3789_v52  ;;  %v720_v60 = vcombine.high %v698_v56, %v698_v56  ;;  %v727_v61 = vrot.slane %v698_v56, %v3793_v57  ;;  %v691_v63 = vcombine.high %v689_v59, %v689_v59 }
 0x1d0   : > { %v982_v46 = vpop.f32.mrb[2].mxu1  ;;  %v705_v3 = vrot.slane %v689_v59, %v3789_v52 }
 0x1d1   : > { %v984_v47 = vpop.f32.mrb[3].mxu1  ;;  %v731_v62 = vrot.slane %v712_v58, %v3793_v57  ;;  %v722_v0 = vcombine.high %v712_v58, %v712_v58  ;;  %v735_v7 = vrot.slane %v720_v60, %v3793_v57  ;;  %v719_v9 = vrot.slane %v691_v63, %v3789_v52 }
 0x1d2   : > { %v3785_v48 = vadd.f32 %v984_v47, %v3782_v45  ;;  %v721_v11 = vcombine.high %v705_v3, %v705_v3  ;;  %v743_v12 = vrot.slane %v705_v3, %v3793_v57  ;;  %v3825_v28 = vadd.f32 %v982_v46, %v3820_v25 }
 0x1d3   : > { %v739_v10 = vrot.slane %v722_v0, %v3793_v57  ;;  %v747_v16 = vrot.slane %v719_v9, %v3793_v57  ;;  %v723_v17 = vcombine.high %v719_v9, %v719_v9  ;;  %v1440_v9 = vld [vmem:[%s4330_s10 + $0x18] sm:$0xff] }
 0x1d4   : > { %1186 = vrot.lane.b32.xlu1 %v3785_v48, %s3537_s0  ;;  %v751_v18 = vrot.slane %v721_v11, %v3793_v57  ;;  %v1097_v11 = vcombine.high %v3785_v48, %v3785_v48 }
 0x1d5   : > { %v755_v22 = vrot.slane %v723_v17, %v3793_v57 }
 0x23d   : > { %v765_v1 = vpop.permute.xlu0 %764 }
 0x23e   : > { %v767_v5 = vadd.f32 %v765_v1, %v727_v61  ;;  %v768_v6 = vadd.f32 %v765_v1, %v731_v62  ;;  %v769_v8 = vadd.f32 %v765_v1, %v735_v7  ;;  %v770_v13 = vadd.f32 %v765_v1, %v739_v10  ;;  %v1439_v7 = vld [vmem:[%s4330_s10 + $0x10] sm:$0xff] }
 0x23f   : > { %v771_v15 = vadd.f32 %v765_v1, %v743_v12  ;;  %v772_v19 = vadd.f32 %v765_v1, %v747_v16  ;;  %v773_v20 = vadd.f32 %v765_v1, %v751_v18  ;;  %v774_v23 = vadd.f32 %v765_v1, %v755_v22 }
 0x240   : > { %3177 = vmatprep.mubr.msk.f32.mxu0 %vm600_vm2, %v767_v5  ;;  %v1437_v5 = vld [vmem:[%s4330_s10] sm:$0xff]  ;;  %v3904_v10 = vpack.c.bf16 %v1440_v9, %v1439_v7  ;;  %v1104_v12 = vrot.slane %v3785_v48, %v3789_v52 }
 0x241   : > { %3178 = vmatmul.mubr.msk.f32.vlgmr.msra.gmra.mrb[2].mxu0 %vm600_vm2, %v768_v6  ;;  %v1438_v6 = vld [vmem:[%s4330_s10 + $0x8] sm:$0xff] }
 0x242   : > { %3180 = vmatprep.mubr.msk.f32.mxu0 %vm600_vm2, %v769_v8  ;;  %3307 = vmatpush3.bf16.msra.mxu0 %v3758_v33  ;;  %v3898_v8 = vpack.c.bf16 %v1438_v6, %v1437_v5 }
 0x243   : > { %3309 = vmatprep.subr.bf16.mxu0 %v3763_v35 }
 0x244   : > { %3300 = vmatpush3.bf16.msra.mxu1 %v3898_v8 }
 0x245   : > { %3181 = vmatmul.mubr.msk.f32.gmra.mrb[4].mxu0 %vm600_vm2, %v770_v13  ;;  %3301 = vmatprep.subr.bf16.mxu1 %v3532_v2  ;;  %v1111_v13 = vrot.slane %v1097_v11, %v3789_v52 }
 0x246   : > { %3183 = vmatprep.mubr.msk.f32.mxu0 %vm600_vm2, %v771_v15  ;;  %3311 = vmatpush3.bf16.msra.mxu0 %v3763_v35  ;;  %v1112_v15 = vcombine.high %v1104_v12, %v1104_v12  ;;  %v1187_v16 = vpop.permute.xlu1 %1186 }
 0x247   : > { %3327 = vmatprep.subr.bf16.mxu0 %v3758_v33  ;;  %v1113_v17 = vcombine.high %v1111_v13, %v1111_v13 }
 0x248   : > { %3303 = vmatpush3.bf16.msra.mxu1 %v3904_v10  ;;  %v1134_v18 = vrot.slane %v1112_v15, %v3789_v52 }
 0x249   : > { %3184 = vmatmul.mubr.msk.f32.gmra.mrb[6].mxu0 %vm600_vm2, %v772_v19  ;;  %3313 = vmatprep.subr.bf16.mxu1 %v3706_v14 }
 0x24a   : > { %3186 = vmatprep.mubr.msk.f32.mxu0 %vm600_vm2, %v773_v20  ;;  %v1120_v20 = vrot.slane %v1104_v12, %v3789_v52 }
 0x24d   : > { %3187 = vmatmul.mubr.msk.f32.gmra.mrb[8].mxu0 %vm600_vm2, %v774_v23  ;;  %v1141_v23 = vrot.slane %v1113_v17, %v3789_v52 }
 0x24e   : > { %v3822_v26 = vpop.permute.xlu0 %1239 }
 0x24f   : > { %v3829_v29 = vmul.f32 %v3822_v26, %v3825_v28  ;;  %v1169_v48 = vrot.slane %v1141_v23, %v3793_v57 }
 0x251   : > { %v1246_v31 = vadd.f32 %v3831_v30, %v3829_v29 }
 0x253   : > { %v1309_v36 = vrot.slane %v1246_v31, %v3789_v52  ;;  %v1302_v39 = vcombine.high %v1246_v31, %v1246_v31  ;;  %v1127_v31 = vrot.slane %v1111_v13, %v3789_v52 }
 0x255   : > { %v1317_v40 = vcombine.high %v1309_v36, %v1309_v36  ;;  %v1316_v43 = vrot.slane %v1302_v39, %v3789_v52  ;;  %v1325_v47 = vrot.slane %v1309_v36, %v3789_v52  ;;  %v1144_v36 = vcombine.high %v1134_v18, %v1134_v18 }
 0x257   : > { %v1339_v44 = vrot.slane %v1317_v40, %v3789_v52  ;;  %v1318_v53 = vcombine.high %v1316_v43, %v1316_v43  ;;  %v1354_v54 = vrot.slane %v1325_v47, %v3793_v57  ;;  %v1347_v55 = vcombine.high %v1325_v47, %v1325_v47 }
 0x258   : > { %v1332_v60 = vrot.slane %v1316_v43, %v3789_v52  ;;  %v1142_v40 = vcombine.high %v1120_v20, %v1120_v20  ;;  %v1143_v47 = vcombine.high %v1127_v31, %v1127_v31 }
 0x259   : > { %v1358_v50 = vrot.slane %v1339_v44, %v3793_v57  ;;  %v1349_v51 = vcombine.high %v1339_v44, %v1339_v44  ;;  %v1346_v58 = vrot.slane %v1318_v53, %v3789_v52  ;;  %v1362_v59 = vrot.slane %v1347_v55, %v3793_v57 }
 0x25a   : > { %v1370_v63 = vrot.slane %v1332_v60, %v3793_v57  ;;  %v1348_v0 = vcombine.high %v1332_v60, %v1332_v60  ;;  %v1145_v44 = vcombine.high %v1141_v23, %v1141_v23  ;;  %v1165_v53 = vrot.slane %v1127_v31, %v3793_v57 }
 0x25b   : > { %v1366_v56 = vrot.slane %v1349_v51, %v3793_v57  ;;  %v1374_v61 = vrot.slane %v1346_v58, %v3793_v57  ;;  %v1350_v62 = vcombine.high %v1346_v58, %v1346_v58  ;;  %v1149_v51 = vrot.slane %v1120_v20, %v3793_v57 }
 0x25c   : > { %v1378_v3 = vrot.slane %v1348_v0, %v3793_v57  ;;  %v1194_v55 = vadd.f32 %v1187_v16, %v1169_v48 }
 0x25d   : > { %v1382_v1 = vrot.slane %v1350_v62, %v3793_v57  ;;  %v1189_v58 = vadd.f32 %v1187_v16, %v1149_v51 }
 0x314   : > { %v3835_v32 = vpop.f32.mrb[2].mxu0 }
 0x315   : > { %1207 = vrot.lane.b32.xlu0 %v3835_v32, %s3537_s0  ;;  %v3839_v34 = vpop.f32.mrb[3].mxu0 }
 0x316   : > { %1205 = vrot.lane.b32.xlu1 %v3839_v34, %s3537_s0 }
 0x318   : > { %v3844_v37 = vpop.f32.mrb[4].mxu0 }
 0x319   : > { %1211 = vrot.lane.b32.xlu0 %v3844_v37, %s3537_s0  ;;  %v3848_v38 = vpop.f32.mrb[5].mxu0 }
 0x31a   : > { %1209 = vrot.lane.b32.xlu1 %v3848_v38, %s3537_s0 }
 0x31c   : > { %v3852_v41 = vpop.f32.mrb[6].mxu0 }
 0x31d   : > { %1215 = vrot.lane.b32.xlu0 %v3852_v41, %s3537_s0  ;;  %v3856_v42 = vpop.f32.mrb[7].mxu0 }
 0x31e   : > { %1213 = vrot.lane.b32.xlu1 %v3856_v42, %s3537_s0 }
 0x320   : > { %v3862_v46 = vpop.f32.mrb[8].mxu0 }
 0x321   : > { %1219 = vrot.lane.b32.xlu0 %v3862_v46, %s3537_s0  ;;  %v3867_v49 = vpop.f32.mrb[9].mxu0 }
 0x322   : > { %1217 = vrot.lane.b32.xlu1 %v3867_v49, %s3537_s0 }
 0x325   : > { %1385 = vrot.lane.b32.xlu0 %v1358_v50, %s3536_s2  ;;  %v1153_v50 = vrot.slane %v1134_v18, %v3793_v57 }
 0x326   : > { %1383 = vrot.lane.b32.xlu1 %v1354_v54, %s3536_s2  ;;  %v1161_v54 = vrot.slane %v1144_v36, %v3793_v57 }
 0x328   : > { %v1192_v62 = vadd.f32 %v1187_v16, %v1161_v54 }
 0x329   : > { %1389 = vrot.lane.b32.xlu0 %v1366_v56, %s3536_s2  ;;  %v1190_v56 = vadd.f32 %v1187_v16, %v1153_v50 }
 0x32a   : > { %1387 = vrot.lane.b32.xlu1 %v1362_v59, %s3536_s2  ;;  %v1157_v59 = vrot.slane %v1142_v40, %v3793_v57 }
 0x32c   : > { %v1191_v7 = vadd.f32 %v1187_v16, %v1157_v59 }
 0x32d   : > { %1393 = vrot.lane.b32.xlu0 %v1374_v61, %s3536_s2  ;;  %v1193_v61 = vadd.f32 %v1187_v16, %v1165_v53 }
 0x32e   : > { %1391 = vrot.lane.b32.xlu1 %v1370_v63, %s3536_s2 }
 0x331   : > { %1397 = vrot.lane.b32.xlu0 %v1382_v1, %s3536_s2  ;;  %v1177_v1 = vrot.slane %v1145_v44, %v3793_v57 }
 0x332   : > { %1395 = vrot.lane.b32.xlu1 %v1378_v3, %s3536_s2  ;;  %v1173_v3 = vrot.slane %v1143_v47, %v3793_v57 }
 0x333   : > { %v1196_v12 = vadd.f32 %v1187_v16, %v1177_v1 }
 0x334   : > { %v1195_v20 = vadd.f32 %v1187_v16, %v1173_v3 }
 0x387   : > { %v1208_v19 = vpop.permute.xlu0 %1207 }
 0x388   : > { %v1206_v22 = vpop.permute.xlu1 %1205  ;;  %v1230_v5 = vadd.f32 %v1208_v19, %v1190_v56 }
 0x389   : > { %v1229_v6 = vadd.f32 %v1206_v22, %v1189_v58 }
 0x38a   : > { %v1248_v36 = vsel %vm600_vm2, %v1230_v5, -inf }
 0x38b   : > { %v1212_v39 = vpop.permute.xlu0 %1211  ;;  %v1247_v40 = vsel %vm600_vm2, %v1229_v6, -inf }
 0x38c   : > { %v1210_v43 = vpop.permute.xlu1 %1209  ;;  %v1232_v11 = vadd.f32 %v1212_v39, %v1192_v62 }
 0x38d   : > { %v1231_v13 = vadd.f32 %v1210_v43, %v1191_v7 }
 0x38e   : > { %v1250_v19 = vsel %vm600_vm2, %v1232_v11, -inf }
 0x38f   : > { %v1216_v60 = vpop.permute.xlu0 %1215  ;;  %v1249_v43 = vsel %vm600_vm2, %v1231_v13, -inf }
 0x390   : > { %v1234_v63 = vadd.f32 %v1216_v60, %v1194_v55  ;;  %v1214_v0 = vpop.permute.xlu1 %1213 }
 0x391   : > { %v1233_v9 = vadd.f32 %v1214_v0, %v1193_v61 }
 0x392   : > { %v1253_v15 = vsel %vm600_vm2, %v1234_v63, -inf }
 0x393   : > { %v1251_v17 = vsel %vm600_vm2, %v1233_v9, -inf  ;;  %v1220_v18 = vpop.permute.xlu0 %1219  ;;  %v1254_v22 = vmax.f32 %v1248_v36, %v1253_v15 }
 0x394   : > { %v1236_v23 = vadd.f32 %v1220_v18, %v1196_v12  ;;  %v1218_v31 = vpop.permute.xlu1 %1217  ;;  %v1252_v44 = vmax.f32 %v1247_v40, %v1251_v17 }
 0x395   : > { %v1235_v48 = vadd.f32 %v1218_v31, %v1195_v20 }
 0x396   : > { %v1257_v39 = vsel %vm600_vm2, %v1236_v23, -inf  ;;  %v1259_v16 = vmax.f32 %v1252_v44, %v1254_v22 }
 0x397   : > { %v1258_v47 = vmax.f32 %v1250_v19, %v1257_v39  ;;  %v1255_v50 = vsel %vm600_vm2, %v1235_v48, -inf }
 0x398   : > { %v1256_v51 = vmax.f32 %v1249_v43, %v1255_v50 }
 0x39a   : > { %v1260_v53 = vmax.f32 %v1256_v51, %v1258_v47 }
 0x39c   : > { %v1261_v54 = vmax.f32 %v1259_v16, %v1260_v53 }
 0x39e   : > { %v1263_v55 = vsub.f32 %v1230_v5, %v1261_v54  ;;  %v1262_v56 = vsub.f32 %v1229_v6, %v1261_v54  ;;  %v1265_v58 = vsub.f32 %v1232_v11, %v1261_v54  ;;  %v1264_v59 = vsub.f32 %v1231_v13, %v1261_v54  ;;  %v1384_v5 = vpop.permute.xlu1 %1383  ;;  %v1386_v11 = vpop.permute.xlu0 %1385 }
 0x39f   : > { %v1266_v62 = vsub.f32 %v1233_v9, %v1261_v54  ;;  %v1267_v3 = vsub.f32 %v1234_v63, %v1261_v54  ;;  %v1268_v7 = vsub.f32 %v1235_v48, %v1261_v54  ;;  %v1269_v17 = vsub.f32 %v1236_v23, %v1261_v54 }
 0x3a0   : > { %v1272_v60 = vmul.f32 1.442695, %v1263_v55  ;;  %v1270_v61 = vmul.f32 1.442695, %v1262_v56  ;;  %v1276_v0 = vmul.f32 1.442695, %v1265_v58 }
 0x3a1   : > { %v1274_v1 = vmul.f32 1.442695, %v1264_v59  ;;  %v1278_v12 = vmul.f32 1.442695, %v1266_v62  ;;  %v1280_v15 = vmul.f32 1.442695, %v1267_v3 }
 0x3a2   : > { %3402 = vpow2.f32 %v1272_v60  ;;  %v1282_v18 = vmul.f32 1.442695, %v1268_v7  ;;  %v1284_v6 = vmul.f32 1.442695, %v1269_v17  ;;  %v1388_v48 = vpop.permute.xlu1 %1387  ;;  %v1390_v39 = vpop.permute.xlu0 %1389 }
 0x3a3   : > { %3404 = vpow2.f32 %v1270_v61 }
 0x3a4   : > { %3406 = vpow2.f32 %v1276_v0 }
 0x3a5   : > { %3408 = vpow2.f32 %v1274_v1 }
 0x3a6   : > { %3410 = vpow2.f32 %v1278_v12  ;;  %v1392_v61 = vpop.permute.xlu1 %1391 }
 0x3a7   : > { %3412 = vpow2.f32 %v1280_v15 }
 0x3a8   : > { %3414 = vpow2.f32 %v1282_v18 }
 0x3a9   : > { %3416 = vpow2.f32 %v1284_v6 }
 0x3ac   : > { %v3403_v13 = vpop.eup %3402 }
 0x3ad   : > { %v3405_v9 = vpop.eup %3404  ;;  %v1287_v20 = vsel %vm600_vm2, %v3403_v13, 0.0  ;;  %v1408_v63 = vmul.f32 %v3403_v13, %v1386_v11 }
 0x3ae   : > { %v3407_v31 = vpop.eup %3406  ;;  %v1286_v36 = vsel %vm600_vm2, %v3405_v9, 0.0  ;;  %v1407_v40 = vmul.f32 %v3405_v9, %v1384_v5  ;;  %v1394_v5 = vpop.permute.xlu0 %1393 }
 0x3af   : > { %v3409_v19 = vpop.eup %3408  ;;  %v1416_v23 = vsel %vm600_vm2, %v1408_v63, 0.0  ;;  %v1288_v22 = vadd.f32 %v1287_v20, %v1286_v36  ;;  %v1410_v16 = vmul.f32 %v3407_v31, %v1390_v39  ;;  %v1291_v54 = vsel %vm600_vm2, %v3407_v31, 0.0  ;;  %v1396_v31 = vpop.permute.xlu1 %1395 }
 0x3b0   : > { %v1415_v44 = vsel %vm600_vm2, %v1407_v40, 0.0  ;;  %v1289_v43 = vsel %vm600_vm2, %v3409_v19, 0.0  ;;  %v1409_v47 = vmul.f32 %v3409_v19, %v1388_v48  ;;  %v3411_v50 = vpop.eup %3410 }
 0x3b1   : > { %v1417_v51 = vadd.f32 %v1416_v23, %v1415_v44  ;;  %v1290_v53 = vadd.f32 %v1289_v43, %v1288_v22  ;;  %v3413_v56 = vpop.eup %3412  ;;  %v1293_v60 = vsel %vm600_vm2, %v3411_v50, 0.0  ;;  %v1420_v0 = vsel %vm600_vm2, %v1410_v16, 0.0 }
 0x3b2   : > { %v1418_v55 = vsel %vm600_vm2, %v1409_v47, 0.0  ;;  %v3415_v62 = vpop.eup %3414  ;;  %v1411_v3 = vmul.f32 %v3411_v50, %v1392_v61  ;;  %v1295_v7 = vsel %vm600_vm2, %v3413_v56, 0.0  ;;  %v1412_v6 = vmul.f32 %v3413_v56, %v1394_v5  ;;  %v1398_v19 = vpop.permute.xlu0 %1397  ;;  %v3046_v56 = vld [vmem:[%s4331_s11] ss:$0 sm:$0xff] }
 0x3b3   : > { %v1419_v58 = vadd.f32 %v1418_v55, %v1417_v51  ;;  %v1292_v59 = vadd.f32 %v1291_v54, %v1290_v53  ;;  %v3417_v15 = vpop.eup %3416  ;;  %v1297_v18 = vsel %vm600_vm2, %v3415_v62, 0.0  ;;  %v1413_v40 = vmul.f32 %v3415_v62, %v1396_v31  ;;  %1519 = vrot.lane.b32.xlu0 %v3046_v56, %s3537_s0 }
 0x3b4   : > { %v1422_v11 = vsel %vm600_vm2, %v1411_v3, 0.0  ;;  %v1299_v20 = vsel %vm600_vm2, %v3417_v15, 0.0  ;;  %v1424_v36 = vsel %vm600_vm2, %v1412_v6, 0.0  ;;  %v1414_v23 = vmul.f32 %v3417_v15, %v1398_v19 }
 0x3b5   : > { %v1294_v1 = vadd.f32 %v1293_v60, %v1292_v59  ;;  %v1421_v12 = vadd.f32 %v1420_v0, %v1419_v58  ;;  %v1426_v22 = vsel %vm600_vm2, %v1413_v40, 0.0  ;;  %v995_v60 = vrot.slane %v3825_v28, %v3789_v52 }
 0x3b6   : > { %v1428_v39 = vsel %vm600_vm2, %v1414_v23, 0.0  ;;  %v988_v61 = vcombine.high %v3825_v28, %v3825_v28 }
 0x3b7   : > { %v1296_v17 = vadd.f32 %v1295_v7, %v1294_v1  ;;  %v1423_v9 = vadd.f32 %v1422_v11, %v1421_v12  ;;  %v1003_v62 = vcombine.high %v995_v60, %v995_v60  ;;  %v1011_v0 = vrot.slane %v995_v60, %v3789_v52 }
 0x3b8   : > { %v1002_v1 = vrot.slane %v988_v61, %v3789_v52 }
 0x3b9   : > { %v1298_v13 = vadd.f32 %v1297_v18, %v1296_v17  ;;  %v1425_v48 = vadd.f32 %v1424_v36, %v1423_v9  ;;  %v1025_v3 = vrot.slane %v1003_v62, %v3789_v52  ;;  %v1033_v7 = vcombine.high %v1011_v0, %v1011_v0 }
 0x3ba   : > { %v1004_v18 = vcombine.high %v1002_v1, %v1002_v1  ;;  %v1018_v5 = vrot.slane %v1002_v1, %v3789_v52 }
 0x3bb   : > { %v1300_v63 = vadd.f32 %v1299_v20, %v1298_v13  ;;  %v1427_v44 = vadd.f32 %v1426_v22, %v1425_v48  ;;  %v1035_v6 = vcombine.high %v1025_v3, %v1025_v3  ;;  %v1044_v11 = vrot.slane %v1025_v3, %v3793_v57 }
 0x3bc   : > { %v1040_v13 = vrot.slane %v1011_v0, %v3793_v57  ;;  %v1048_v9 = vrot.slane %v1033_v7, %v3793_v57  ;;  %v1032_v40 = vrot.slane %v1004_v18, %v3789_v52  ;;  %v1056_v23 = vrot.slane %v1018_v5, %v3793_v57 }
 0x3bd   : > { %3418 = vrcp.f32 %v1300_v63  ;;  %v1429_v43 = vadd.f32 %v1428_v39, %v1427_v44  ;;  %v1034_v22 = vcombine.high %v1018_v5, %v1018_v5 }
 0x3c7   : > { %v3419_v47 = vpop.eup %3418 }
 0x3c8   : > { %v1431_v50 = vmul.f32 %v3419_v47, %v1429_v43  ;;  %v1060_v47 = vrot.slane %v1032_v40, %v3793_v57 }
 0x3ca   : > { %v1432_v51 = vsub.f32 0.0, %v1431_v50  ;;  %v1036_v50 = vcombine.high %v1032_v40, %v1032_v40 }
 0x3cc   : > { %v1433_v16 = vmul.f32 1.442695, %v1432_v51 }
 0x3ce   : > { %3420 = vpow2.f32 %v1433_v16 }
 0x3d8   : > { %v3421_v53 = vpop.eup %3420 }
 0x3d9   : > { %v1435_v54 = vadd.f32 1.0, %v3421_v53  ;;  %v1068_v53 = vrot.slane %v1036_v50, %v3793_v57 }
 0x3db   : > { %3422 = vrcp.f32 %v1435_v54 }
 0x3e5   : > { %v3423_v55 = vpop.eup %3422 }
 0x3e6   : > { %3198 = vmatmul.mubr.msk.f32.vlgmr.msra.gmra.mrb[4].mxu1 %vm600_vm2, %v3423_v55 }
 0x3e7   : > { %3315 = vmatpush1.bf16.msra.mxu1 %v3724_v21  ;;  %1721 = vmatprep.mubr.f32.mxu1 %v3534_v4 }
 0x3e8   : > { %3317 = vmatprep.subr.bf16.mxu1 %v3726_v24 }
 0x3eb   : > { %3319 = vmatpush1.bf16.msra.mxu1 %v3736_v27 }
 0x3ec   : > { %3320 = vmatprep.subr.bf16.mxu1 %v3532_v2 }
 0x425   : > { %v3970_v15 = vpop.permute.xlu0 %1519 }
 0x4b9   : > { %v1510_v58 = vpop.f32.mrb[4].mxu1 }
 0x4ba   : > { %1515 = vrot.lane.b32.xlu1 %v1510_v58, %s3537_s0  ;;  %v3199_v59 = vpop.f32.mrb[5].mxu1 }
 0x4be   : > { %1077 = vrot.lane.b32.xlu1 %v3825_v28, %s3537_s0 }
 0x52c   : > { %v1516_v12 = vpop.permute.xlu1 %1515 }
 0x52d   : > { %v1518_v17 = vadd.f32 %v1516_v12, %v3829_v29  ;;  %v1052_v29 = vrot.slane %v1035_v6, %v3793_v57 }
 0x52f   : > { %v1522_v28 = vadd.f32 %v3970_v15, %v1518_v17 }
 0x530   : > { %v1078_v20 = vpop.permute.xlu1 %1077 }
 0x531   : > { %1653 = vrot.lane.b32.xlu0 %v1522_v28, %s3539_s25  ;;  %v1080_v63 = vadd.f32 %v1078_v20, %v1040_v13  ;;  %v1081_v31 = vadd.f32 %v1078_v20, %v1044_v11  ;;  %v1082_v36 = vadd.f32 %v1078_v20, %v1048_v9  ;;  %v1083_v44 = vadd.f32 %v1078_v20, %v1052_v29 }
 0x532   : > { %v1084_v43 = vadd.f32 %v1078_v20, %v1056_v23  ;;  %v1085_v51 = vadd.f32 %v1078_v20, %v1060_v47  ;;  %v1087_v55 = vadd.f32 %v1078_v20, %v1068_v53 }
 0x533   : > { %v1088_v48 = vadd.f32 %v1080_v63, %v3839_v34  ;;  %v1089_v19 = vadd.f32 %v3835_v32, %v1081_v31  ;;  %v1090_v39 = vadd.f32 %v1082_v36, %v3848_v38  ;;  %v1064_v34 = vrot.slane %v1034_v22, %v3793_v57 }
 0x534   : > { %v1091_v32 = vadd.f32 %v3844_v37, %v1083_v44  ;;  %v1092_v16 = vadd.f32 %v1084_v43, %v3856_v42  ;;  %v1093_v54 = vadd.f32 %v3852_v41, %v1085_v51  ;;  %v1095_v37 = vadd.f32 %v3862_v46, %v1087_v55 }
 0x535   : > { %3208 = vmatprep.mubr.msk.f32.mxu0 %vm600_vm2, %v1088_v48  ;;  %v1086_v38 = vadd.f32 %v1078_v20, %v1064_v34 }
 0x536   : > { %3209 = vmatmul.mubr.msk.f32.vlgmr.msra.gmra.mrb[10].mxu0 %vm600_vm2, %v1089_v19 }
 0x537   : > { %3211 = vmatprep.mubr.msk.f32.mxu0 %vm600_vm2, %v1090_v39  ;;  %3329 = vmatpush3.bf16.msra.mxu0 %v3758_v33  ;;  %v1094_v33 = vadd.f32 %v1086_v38, %v3867_v49 }
 0x538   : > { %3331 = vmatprep.subr.bf16.mxu0 %v3763_v35 }
 0x53a   : > { %3212 = vmatmul.mubr.msk.f32.gmra.mrb[12].mxu0 %vm600_vm2, %v1091_v32 }
 0x53b   : > { %3214 = vmatprep.mubr.msk.f32.mxu0 %vm600_vm2, %v1092_v16  ;;  %3333 = vmatpush3.bf16.msra.mxu0 %v3763_v35 }
 0x53c   : > { %3348 = vmatprep.subr.bf16.mxu0 %v3532_v2 }
 0x53e   : > { %3215 = vmatmul.mubr.msk.f32.gmra.mrb[14].mxu0 %vm600_vm2, %v1093_v54 }
 0x53f   : > { %3217 = vmatprep.mubr.msk.f32.mxu0 %vm600_vm2, %v1094_v33 }
 0x542   : > { %3218 = vmatmul.mubr.msk.f32.gmra.mrb[16].mxu0 %vm600_vm2, %v1095_v37 }
 0x5a3   : > { %v1654_v42 = vpop.permute.xlu0 %1653 }
 0x5a4   : > { %3069 = vmatmul.mubr.msk.f32.vlgmr.msra.gmra.mrb[6].mxu1 %vm600_vm2, %v1654_v42 }
 0x5a5   : > { %3322 = vmatpush3.bf16.msra.mxu1 %v3898_v8  ;;  %3228 = vmatprep.mubr.msk.f32.mxu1 %vm3533_vm0, %v3534_v4 }
 0x5a6   : > { %3323 = vmatprep.subr.bf16.mxu1 %v3532_v2 }
 0x5a9   : > { %3325 = vmatpush3.bf16.msra.mxu1 %v3904_v10 }
 0x5aa   : > { %3335 = vmatprep.subr.bf16.mxu1 %v3706_v14 }
 0x609   : > { %v4012_v35 = vpop.f32.mrb[10].mxu0 }
 0x60a   : > { %1948 = vrot.lane.b32.xlu1 %v4012_v35, %s3537_s0  ;;  %v4016_v41 = vpop.f32.mrb[11].mxu0 }
 0x60b   : > { %1946 = vrot.lane.b32.xlu0 %v4016_v41, %s3537_s0 }
 0x60d   : > { %v4020_v46 = vpop.f32.mrb[12].mxu0 }
 0x60e   : > { %1952 = vrot.lane.b32.xlu1 %v4020_v46, %s3537_s0  ;;  %v4024_v49 = vpop.f32.mrb[13].mxu0 }
 0x60f   : > { %1950 = vrot.lane.b32.xlu0 %v4024_v49, %s3537_s0 }
 0x611   : > { %v4028_v14 = vpop.f32.mrb[14].mxu0 }
 0x612   : > { %1956 = vrot.lane.b32.xlu1 %v4028_v14, %s3537_s0  ;;  %v4032_v56 = vpop.f32.mrb[15].mxu0 }
 0x613   : > { %1954 = vrot.lane.b32.xlu0 %v4032_v56, %s3537_s0 }
 0x615   : > { %v4036_v58 = vpop.f32.mrb[16].mxu0 }
 0x616   : > { %v4038_v59 = vpop.f32.mrb[17].mxu0 }
 0x617   : > { %1958 = vrot.lane.b32.xlu0 %v4038_v59, %s3537_s0 }
 0x677   : > { %v1723_v60 = vpop.f32.mrb[6].mxu1 }
 0x678   : > { %v4043_v61 = vadd.f32 %v1723_v60, %v3820_v25  ;;  %v1725_v62 = vpop.f32.mrb[7].mxu1 }
 0x679   : > { %v1726_v0 = vadd.f32 %v1725_v62, %v3782_v45 }
 0x67a   : > { %v4048_v1 = vmul.f32 %v4043_v61, %v3822_v26 }
 0x67b   : > { %1927 = vrot.lane.b32.xlu1 %v1726_v0, %s3537_s0  ;;  %v1838_v39 = vcombine.high %v1726_v0, %v1726_v0  ;;  %v1845_v43 = vrot.slane %v1726_v0, %v3789_v52 }
 0x67c   : > { %v1979_v3 = vadd.f32 %v4048_v1, %v3831_v30  ;;  %v1949_v50 = vpop.permute.xlu1 %1948 }
 0x67d   : > { %v1852_v47 = vrot.slane %v1838_v39, %v3789_v52  ;;  %v1947_v34 = vpop.permute.xlu0 %1946  ;;  %v1853_v32 = vcombine.high %v1845_v43, %v1845_v43  ;;  %v1861_v38 = vrot.slane %v1845_v43, %v3789_v52 }
 0x67e   : > { %v2042_v7 = vrot.slane %v1979_v3, %v3789_v52  ;;  %v2035_v12 = vcombine.high %v1979_v3, %v1979_v3 }
 0x67f   : > { %1960 = vrot.lane.b32.xlu1 %v4036_v58, %s3537_s0  ;;  %v1854_v51 = vcombine.high %v1852_v47, %v1852_v47  ;;  %v1875_v53 = vrot.slane %v1853_v32, %v3789_v52  ;;  %v1868_v55 = vrot.slane %v1852_v47, %v3789_v52  ;;  %v1883_v37 = vcombine.high %v1861_v38, %v1861_v38 }
 0x680   : > { %v2058_v17 = vrot.slane %v2042_v7, %v3789_v52  ;;  %v2050_v18 = vcombine.high %v2042_v7, %v2042_v7  ;;  %v2049_v5 = vrot.slane %v2035_v12, %v3789_v52  ;;  %v1953_v16 = vpop.permute.xlu1 %1952  ;;  %v1890_v7 = vrot.slane %v1861_v38, %v3793_v57 }
 0x681   : > { %v1951_v54 = vpop.permute.xlu0 %1950  ;;  %v1882_v33 = vrot.slane %v1854_v51, %v3789_v52  ;;  %v1885_v42 = vcombine.high %v1875_v53, %v1875_v53  ;;  %v1884_v60 = vcombine.high %v1868_v55, %v1868_v55  ;;  %v1894_v12 = vrot.slane %v1875_v53, %v3793_v57 }
 0x682   : > { %v2087_v6 = vrot.slane %v2058_v17, %v3793_v57  ;;  %v2072_v11 = vrot.slane %v2050_v18, %v3789_v52  ;;  %v2080_v28 = vcombine.high %v2058_v17, %v2058_v17  ;;  %v2051_v20 = vcombine.high %v2049_v5, %v2049_v5 }
 0x683   : > { %v2065_v31 = vrot.slane %v2049_v5, %v3789_v52  ;;  %v1886_v0 = vcombine.high %v1882_v33, %v1882_v33  ;;  %v1898_v17 = vrot.slane %v1883_v37, %v3793_v57  ;;  %v1902_v18 = vrot.slane %v1885_v42, %v3793_v57 }
 0x684   : > { %2116 = vrot.lane.b32.xlu0 %v2087_v6, %s3536_s2  ;;  %v2091_v13 = vrot.slane %v2072_v11, %v3793_v57  ;;  %v2082_v9 = vcombine.high %v2072_v11, %v2072_v11  ;;  %v2095_v63 = vrot.slane %v2080_v28, %v3793_v57  ;;  %v2079_v29 = vrot.slane %v2051_v20, %v3789_v52  ;;  %v1957_v62 = vpop.permute.xlu1 %1956 }
 0x685   : > { %v2103_v40 = vrot.slane %v2065_v31, %v3793_v57  ;;  %v2081_v48 = vcombine.high %v2065_v31, %v2065_v31  ;;  %v1955_v3 = vpop.permute.xlu0 %1954  ;;  %v1906_v5 = vrot.slane %v1868_v55, %v3793_v57  ;;  %v1914_v6 = vrot.slane %v1884_v60, %v3793_v57 }
 0x686   : > { %2118 = vrot.lane.b32.xlu1 %v2091_v13, %s3536_s2  ;;  %v2099_v36 = vrot.slane %v2082_v9, %v3793_v57  ;;  %v2107_v19 = vrot.slane %v2079_v29, %v3793_v57  ;;  %v2083_v23 = vcombine.high %v2079_v29, %v2079_v29  ;;  %v1910_v28 = vrot.slane %v1882_v33, %v3793_v57 }
 0x687   : > { %v2111_v22 = vrot.slane %v2081_v48, %v3793_v57  ;;  %v1918_v13 = vrot.slane %v1886_v0, %v3793_v57 }
 0x688   : > { %2120 = vrot.lane.b32.xlu0 %v2095_v63, %s3536_s2  ;;  %v2115_v44 = vrot.slane %v2083_v23, %v3793_v57 }
 0x68a   : > { %2122 = vrot.lane.b32.xlu1 %v2099_v36, %s3536_s2 }
 0x68c   : > { %2124 = vrot.lane.b32.xlu0 %v2103_v40, %s3536_s2 }
 0x68e   : > { %2126 = vrot.lane.b32.xlu1 %v2107_v19, %s3536_s2  ;;  %v1959_v19 = vpop.permute.xlu0 %1958 }
 0x690   : > { %2128 = vrot.lane.b32.xlu0 %v2111_v22, %s3536_s2 }
 0x692   : > { %2130 = vrot.lane.b32.xlu1 %v2115_v44, %s3536_s2 }
 0x696   : > { %1818 = vrot.lane.b32.xlu1 %v4043_v61, %s3537_s0 }
 0x6ed   : > { %v1928_v11 = vpop.permute.xlu1 %1927 }
 0x6ee   : > { %v1930_v9 = vadd.f32 %v1928_v11, %v1890_v7  ;;  %v1931_v20 = vadd.f32 %v1928_v11, %v1894_v12  ;;  %v1932_v63 = vadd.f32 %v1928_v11, %v1898_v17  ;;  %v1933_v31 = vadd.f32 %v1928_v11, %v1902_v18 }
 0x6ef   : > { %v1934_v36 = vadd.f32 %v1928_v11, %v1906_v5  ;;  %v1935_v29 = vadd.f32 %v1928_v11, %v1910_v28  ;;  %v1936_v40 = vadd.f32 %v1928_v11, %v1914_v6  ;;  %v1937_v48 = vadd.f32 %v1928_v11, %v1918_v13 }
 0x6f0   : > { %v1970_v23 = vadd.f32 %v1947_v34, %v1930_v9  ;;  %v1971_v22 = vadd.f32 %v1949_v50, %v1931_v20  ;;  %v1972_v44 = vadd.f32 %v1951_v54, %v1932_v63  ;;  %v1973_v39 = vadd.f32 %v1953_v16, %v1933_v31 }
 0x6f1   : > { %v1961_v43 = vpop.permute.xlu1 %1960  ;;  %v1974_v47 = vadd.f32 %v1955_v3, %v1934_v36  ;;  %v1975_v32 = vadd.f32 %v1957_v62, %v1935_v29  ;;  %v1976_v51 = vadd.f32 %v1959_v19, %v1936_v40  ;;  %v1729_v11 = vcombine.high %v4043_v61, %v4043_v61 }
 0x6f2   : > { %v1977_v38 = vadd.f32 %v1961_v43, %v1937_v48  ;;  %v1980_v53 = vsel %vm600_vm2, %v1970_v23, -inf  ;;  %v1981_v55 = vsel %vm600_vm2, %v1971_v22, -inf  ;;  %v1982_v33 = vsel %vm600_vm2, %v1972_v44, -inf }
 0x6f3   : > { %v1984_v37 = vsel %vm600_vm2, %v1974_v47, -inf  ;;  %v1986_v42 = vsel %vm600_vm2, %v1975_v32, -inf  ;;  %v1988_v34 = vsel %vm600_vm2, %v1976_v51, -inf  ;;  %v1983_v50 = vsel %vm600_vm2, %v1973_v39, -inf }
 0x6f4   : > { %v1985_v16 = vmax.f32 %v1980_v53, %v1984_v37  ;;  %v1987_v54 = vmax.f32 %v1981_v55, %v1986_v42  ;;  %v1990_v60 = vsel %vm600_vm2, %v1977_v38, -inf  ;;  %v1989_v62 = vmax.f32 %v1982_v33, %v1988_v34 }
 0x6f5   : > { %v1991_v0 = vmax.f32 %v1983_v50, %v1990_v60  ;;  %v1736_v13 = vrot.slane %v4043_v61, %v3789_v52  ;;  %v1743_v48 = vrot.slane %v1729_v11, %v3789_v52 }
 0x6f6   : > { %v1992_v3 = vmax.f32 %v1985_v16, %v1987_v54  ;;  %v2117_v55 = vpop.permute.xlu0 %2116 }
 0x6f7   : > { %v1993_v7 = vmax.f32 %v1989_v62, %v1991_v0  ;;  %v1744_v19 = vcombine.high %v1736_v13, %v1736_v13  ;;  %v1745_v43 = vcombine.high %v1743_v48, %v1743_v48  ;;  %v1759_v42 = vrot.slane %v1743_v48, %v3789_v52 }
 0x6f8   : > { %v2119_v17 = vpop.permute.xlu1 %2118 }
 0x6f9   : > { %v1994_v12 = vmax.f32 %v1992_v3, %v1993_v7  ;;  %v1766_v53 = vrot.slane %v1744_v19, %v3789_v52  ;;  %v1773_v50 = vrot.slane %v1745_v43, %v3789_v52 }
 0x6fb   : > { %v1998_v18 = vsub.f32 %v1973_v39, %v1994_v12  ;;  %v1995_v5 = vsub.f32 %v1970_v23, %v1994_v12  ;;  %v1996_v6 = vsub.f32 %v1971_v22, %v1994_v12  ;;  %v1997_v28 = vsub.f32 %v1972_v44, %v1994_v12 }
 0x6fc   : > { %v1999_v63 = vsub.f32 %v1974_v47, %v1994_v12  ;;  %v2123_v36 = vpop.permute.xlu1 %2122  ;;  %v2000_v40 = vsub.f32 %v1975_v32, %v1994_v12  ;;  %v1752_v22 = vrot.slane %v1736_v13, %v3789_v52  ;;  %v2001_v39 = vsub.f32 %v1976_v51, %v1994_v12 }
 0x6fd   : > { %v2009_v9 = vmul.f32 1.442695, %v1998_v18  ;;  %v2003_v20 = vmul.f32 1.442695, %v1995_v5  ;;  %v2005_v31 = vmul.f32 1.442695, %v1996_v6  ;;  %v2002_v47 = vsub.f32 %v1977_v38, %v1994_v12 }
 0x6fe   : > { %v2007_v29 = vmul.f32 1.442695, %v1997_v28  ;;  %v2011_v23 = vmul.f32 1.442695, %v1999_v63  ;;  %v2013_v61 = vmul.f32 1.442695, %v2000_v40  ;;  %v1774_v32 = vcombine.high %v1752_v22, %v1752_v22  ;;  %v2121_v28 = vpop.permute.xlu0 %2120 }
 0x6ff   : > { %3424 = vpow2.f32 %v2009_v9  ;;  %v2015_v33 = vmul.f32 1.442695, %v2001_v39  ;;  %v2017_v34 = vmul.f32 1.442695, %v2002_v47  ;;  %v1785_v51 = vrot.slane %v1766_v53, %v3793_v57 }
 0x700   : > { %3426 = vpow2.f32 %v2003_v20  ;;  %v4107_v44 = vpop.permute.xlu1 %2126  ;;  %v1781_v16 = vrot.slane %v1752_v22, %v3793_v57  ;;  %v1789_v60 = vrot.slane %v1774_v32, %v3793_v57  ;;  %v1776_v62 = vcombine.high %v1766_v53, %v1766_v53 }
 0x701   : > { %3428 = vpow2.f32 %v2005_v31  ;;  %v1797_v12 = vrot.slane %v1759_v42, %v3793_v57  ;;  %v1775_v18 = vcombine.high %v1759_v42, %v1759_v42  ;;  %v1777_v13 = vcombine.high %v1773_v50, %v1773_v50 }
 0x702   : > { %3430 = vpow2.f32 %v2007_v29  ;;  %v1793_v47 = vrot.slane %v1776_v62, %v3793_v57 }
 0x703   : > { %3432 = vpow2.f32 %v2011_v23  ;;  %v1805_v53 = vrot.slane %v1775_v18, %v3793_v57 }
 0x704   : > { %v4110_v37 = vpop.permute.xlu1 %2130  ;;  %3434 = vpow2.f32 %v2013_v61 }
 0x705   : > { %3436 = vpow2.f32 %v2015_v33 }
 0x706   : > { %3438 = vpow2.f32 %v2017_v34  ;;  %v1809_v34 = vrot.slane %v1777_v13, %v3793_v57 }
 0x708   : > { %v1819_v38 = vpop.permute.xlu1 %1818 }
 0x709   : > { %v3425_v54 = vpop.eup %3424  ;;  %v1821_v3 = vadd.f32 %v1819_v38, %v1781_v16  ;;  %v1822_v7 = vadd.f32 %v1819_v38, %v1785_v51  ;;  %v1823_v23 = vadd.f32 %v1819_v38, %v1789_v60  ;;  %v2125_v16 = vpop.permute.xlu0 %2124 }
 0x70a   : > { %v3427_v0 = vpop.eup %3426  ;;  %v2143_v31 = vmul.f32 %v3425_v54, %v2123_v36 }
 0x70b   : > { %v3429_v5 = vpop.eup %3428  ;;  %v2019_v6 = vsel %vm600_vm2, %v3427_v0, 0.0  ;;  %v2140_v11 = vmul.f32 %v3427_v0, %v2117_v55  ;;  %v1829_v29 = vadd.f32 %v1821_v3, %v4016_v41  ;;  %v1830_v43 = vadd.f32 %v4012_v35, %v1822_v7 }
 0x70c   : > { %v3431_v9 = vpop.eup %3430  ;;  %v2020_v20 = vsel %vm600_vm2, %v3429_v5, 0.0  ;;  %v2141_v63 = vmul.f32 %v3429_v5, %v2119_v17  ;;  %v1801_v41 = vrot.slane %v1773_v50, %v3793_v57  ;;  %v2024_v55 = vsel %vm600_vm2, %v3425_v54, 0.0 }
 0x70d   : > { %v2148_v40 = vsel %vm600_vm2, %v2140_v11, 0.0  ;;  %v2021_v48 = vadd.f32 %v2020_v20, %v2019_v6  ;;  %v2142_v19 = vmul.f32 %v3431_v9, %v2121_v28  ;;  %v3433_v22 = vpop.eup %3432  ;;  %v2022_v61 = vsel %vm600_vm2, %v3431_v9, 0.0  ;;  %3239 = vmatprep.mubr.msk.f32.mxu0 %vm600_vm2, %v1829_v29 }
 0x70e   : > { %v2149_v39 = vsel %vm600_vm2, %v2141_v63, 0.0  ;;  %v3435_v32 = vpop.eup %3434  ;;  %v2153_v42 = vsel %vm600_vm2, %v2143_v31, 0.0  ;;  %3240 = vmatmul.mubr.msk.f32.vlgmr.msra.gmra.mrb[18].mxu0 %vm600_vm2, %v1830_v43  ;;  %v2026_v51 = vsel %vm600_vm2, %v3433_v22, 0.0  ;;  %v1831_v50 = vadd.f32 %v1823_v23, %v4024_v49 }
 0x70f   : > { %v2150_v17 = vadd.f32 %v2149_v39, %v2148_v40  ;;  %v2023_v36 = vadd.f32 %v2022_v61, %v2021_v48  ;;  %v2151_v33 = vsel %vm600_vm2, %v2142_v19, 0.0  ;;  %v2144_v62 = vmul.f32 %v3433_v22, %v2125_v16  ;;  %v3437_v54 = vpop.eup %3436  ;;  %v2129_v19 = vpop.permute.xlu0 %2128 }
 0x710   : > { %v1824_v0 = vadd.f32 %v1819_v38, %v1793_v47  ;;  %v1825_v3 = vadd.f32 %v1819_v38, %v1797_v12  ;;  %v1826_v7 = vadd.f32 %v1819_v38, %v1801_v41  ;;  %v2028_v5 = vsel %vm600_vm2, %v3435_v32, 0.0  ;;  %3242 = vmatprep.mubr.msk.f32.mxu0 %vm600_vm2, %v1831_v50  ;;  %v3439_v49 = vpop.eup %3438 }
 0x711   : > { %v2152_v35 = vadd.f32 %v2151_v33, %v2150_v17  ;;  %v2025_v60 = vadd.f32 %v2024_v55, %v2023_v36  ;;  %v1827_v6 = vadd.f32 %v1819_v38, %v1805_v53  ;;  %v1828_v11 = vadd.f32 %v1819_v38, %v1809_v34 }
 0x712   : > { %v1832_v13 = vadd.f32 %v4020_v46, %v1824_v0  ;;  %v1833_v9 = vadd.f32 %v1825_v3, %v4032_v56  ;;  %v1834_v20 = vadd.f32 %v4028_v14, %v1826_v7  ;;  %v2030_v29 = vsel %vm600_vm2, %v3437_v54, 0.0 }
 0x713   : > { %v2027_v18 = vadd.f32 %v2026_v51, %v2025_v60  ;;  %v2154_v28 = vadd.f32 %v2153_v42, %v2152_v35  ;;  %v1835_v12 = vadd.f32 %v1827_v6, %v4038_v59  ;;  %v1836_v31 = vadd.f32 %v4036_v58, %v1828_v11 }
 0x714   : > { %3243 = vmatmul.mubr.msk.f32.gmra.mrb[20].mxu0 %vm600_vm2, %v1832_v13  ;;  %v2155_v40 = vsel %vm600_vm2, %v2144_v62, 0.0  ;;  %v2145_v38 = vmul.f32 %v3435_v32, %v4107_v44  ;;  %v2032_v46 = vsel %vm600_vm2, %v3439_v49, 0.0  ;;  %v2146_v59 = vmul.f32 %v3437_v54, %v2129_v19 }
 0x715   : > { %v2029_v63 = vadd.f32 %v2028_v5, %v2027_v18  ;;  %3245 = vmatprep.mubr.msk.f32.mxu0 %vm600_vm2, %v1833_v9  ;;  %v2156_v14 = vadd.f32 %v2155_v40, %v2154_v28  ;;  %v2147_v22 = vmul.f32 %v3439_v49, %v4110_v37 }
 0x716   : > { %v2157_v58 = vsel %vm600_vm2, %v2145_v38, 0.0  ;;  %v2159_v44 = vsel %vm600_vm2, %v2146_v59, 0.0 }
 0x717   : > { %v2031_v48 = vadd.f32 %v2030_v29, %v2029_v63  ;;  %v2158_v23 = vadd.f32 %v2157_v58, %v2156_v14  ;;  %v2161_v61 = vsel %vm600_vm2, %v2147_v22, 0.0 }
 0x718   : > { %3246 = vmatmul.mubr.msk.f32.gmra.mrb[22].mxu0 %vm600_vm2, %v1834_v20 }
 0x719   : > { %v2033_v56 = vadd.f32 %v2032_v46, %v2031_v48  ;;  %3248 = vmatprep.mubr.msk.f32.mxu0 %vm600_vm2, %v1835_v12  ;;  %v2160_v39 = vadd.f32 %v2159_v44, %v2158_v23 }
 0x71b   : > { %3440 = vrcp.f32 %v2033_v56  ;;  %v2162_v43 = vadd.f32 %v2161_v61, %v2160_v39 }
 0x71c   : > { %3249 = vmatmul.mubr.msk.f32.gmra.mrb[24].mxu0 %vm600_vm2, %v1836_v31 }
 0x71d   : > { %3270 = vmatprep.mubr.msk.f32.mxu0 %vm3533_vm0, %v3534_v4 }
 0x725   : > { %v3441_v47 = vpop.eup %3440 }
 0x726   : > { %v2164_v17 = vmul.f32 %v3441_v47, %v2162_v43 }
 0x728   : > { %v2165_v36 = vsub.f32 0.0, %v2164_v17 }
 0x72a   : > { %v2166_v41 = vmul.f32 1.442695, %v2165_v36 }
 0x72c   : > { %3442 = vpow2.f32 %v2166_v41 }
 0x736   : > { %v3443_v53 = vpop.eup %3442 }
 0x737   : > { %v2168_v32 = vadd.f32 1.0, %v3443_v53 }
 0x739   : > { %3444 = vrcp.f32 %v2168_v32 }
 0x743   : > { %v3445_v55 = vpop.eup %3444 }
 0x744   : > { %3229 = vmatmul.mubr.msk.f32.vlgmr.msra.gmra.mrb[8].mxu1 %vm600_vm2, %v3445_v55 }
 0x745   : > { %3337 = vmatpush1.bf16.msra.mxu1 %v3724_v21  ;;  %2447 = vmatprep.mubr.f32.mxu1 %v3534_v4 }
 0x746   : > { %3339 = vmatprep.subr.bf16.mxu1 %v3726_v24 }
 0x749   : > { %3341 = vmatpush1.bf16.msra.mxu1 %v3736_v27 }
 0x74a   : > { %3342 = vmatprep.subr.bf16.mxu1 %v3532_v2 }
 0x7e1   : > { %v3241_v37 = vpop.f32.mrb[18].mxu0 }
 0x7e2   : > { %2565 = vrot.lane.b32.xlu1 %v3241_v37, %s3537_s0  ;;  %v2339_v33 = vpop.f32.mrb[19].mxu0 }
 0x7e7   : > { %v3244_v42 = vpop.f32.mrb[20].mxu0 }
 0x7e8   : > { %2569 = vrot.lane.b32.xlu1 %v3244_v42, %s3537_s0  ;;  %v2349_v34 = vpop.f32.mrb[21].mxu0 }
 0x7eb   : > { %v3247_v35 = vpop.f32.mrb[22].mxu0 }
 0x7ec   : > { %2573 = vrot.lane.b32.xlu1 %v3247_v35, %s3537_s0  ;;  %v2359_v21 = vpop.f32.mrb[23].mxu0 }
 0x7ef   : > { %v3250_v51 = vpop.f32.mrb[24].mxu0 }
 0x7f0   : > { %v2369_v16 = vpop.f32.mrb[25].mxu0 }
 0x817   : > { %v2239_v60 = vpop.f32.mrb[8].mxu1 }
 0x818   : > { %2244 = vrot.lane.b32.xlu0 %v2239_v60, %s3537_s0  ;;  %v3230_v24 = vpop.f32.mrb[9].mxu1 }
 0x854   : > { %v2566_v56 = vpop.permute.xlu1 %2565 }
 0x85a   : > { %v2570_v44 = vpop.permute.xlu1 %2569 }
 0x85e   : > { %v2574_v41 = vpop.permute.xlu1 %2573 }
 0x88a   : > { %v2245_v27 = vpop.permute.xlu0 %2244 }
 0x88b   : > { %v2247_v50 = vadd.f32 %v2245_v27, %v4048_v1 }
 0x88d   : > { %v2248_v62 = vadd.f32 %v2247_v50, %v3970_v15 }
 0x88f   : > { %2379 = vrot.lane.b32.xlu0 %v2248_v62, %s3539_s25 }
 0x893   : > { %2563 = vrot.lane.b32.xlu0 %v2339_v33, %s3537_s0 }
 0x897   : > { %2567 = vrot.lane.b32.xlu0 %v2349_v34, %s3537_s0 }
 0x89b   : > { %2571 = vrot.lane.b32.xlu0 %v2359_v21, %s3537_s0 }
 0x89f   : > { %2575 = vrot.lane.b32.xlu0 %v2369_v16, %s3537_s0 }
 0x901   : > { %v2380_v0 = vpop.permute.xlu0 %2379 }
 0x902   : > { %3079 = vmatmul.mubr.msk.f32.vlgmr.msra.gmra.mrb[10].mxu1 %vm600_vm2, %v2380_v0 }
 0x903   : > { %3344 = vmatpush3.bf16.msra.mxu1 %v3898_v8  ;;  %3259 = vmatprep.mubr.msk.f32.mxu1 %vm3533_vm0, %v3534_v4 }
 0x904   : > { %3345 = vmatprep.subr.bf16.mxu1 %v3532_v2 }
 0x905   : > { %v2564_v58 = vpop.permute.xlu0 %2563 }
 0x907   : > { %3347 = vmatpush3.bf16.msra.mxu1 %v3904_v10 }
 0x909   : > { %v2568_v22 = vpop.permute.xlu0 %2567 }
 0x90d   : > { %v2572_v55 = vpop.permute.xlu0 %2571 }
 0x9d5   : > { %v2449_v1 = vpop.f32.mrb[10].mxu1 }
 0x9d6   : > { %v2450_v3 = vadd.f32 %v2449_v1, %v3820_v25  ;;  %v2451_v7 = vpop.f32.mrb[11].mxu1 }
 0x9d7   : > { %v2452_v54 = vadd.f32 %v2451_v7, %v3782_v45 }
 0x9d8   : > { %v4184_v18 = vmul.f32 %v2450_v3, %v3822_v26  ;;  %v2576_v3 = vpop.permute.xlu0 %2575 }
 0x9d9   : > { %2544 = vrot.lane.b32.xlu1 %v2452_v54, %s3537_s0  ;;  %v2455_v46 = vcombine.high %v2452_v54, %v2452_v54  ;;  %v2462_v14 = vrot.slane %v2452_v54, %v3789_v52 }
 0x9da   : > { %v2596_v8 = vadd.f32 %v4184_v18, %v3831_v30 }
 0x9db   : > { %v2469_v19 = vrot.slane %v2455_v46, %v3789_v52  ;;  %v2470_v59 = vcombine.high %v2462_v14, %v2462_v14  ;;  %v2478_v39 = vrot.slane %v2462_v14, %v3789_v52 }
 0x9dc   : > { %v2652_v5 = vcombine.high %v2596_v8, %v2596_v8  ;;  %v2659_v4 = vrot.slane %v2596_v8, %v3789_v52 }
 0x9dd   : > { %2577 = vrot.lane.b32.xlu1 %v3250_v51, %s3537_s0  ;;  %v2471_v23 = vcombine.high %v2469_v19, %v2469_v19  ;;  %v2492_v61 = vrot.slane %v2470_v59, %v3789_v52  ;;  %v2485_v43 = vrot.slane %v2469_v19, %v3789_v52  ;;  %v2500_v17 = vcombine.high %v2478_v39, %v2478_v39 }
 0x9de   : > { %v2675_v10 = vrot.slane %v2659_v4, %v3789_v52  ;;  %v2667_v6 = vcombine.high %v2659_v4, %v2659_v4  ;;  %v2666_v25 = vrot.slane %v2652_v5, %v3789_v52  ;;  %v2507_v37 = vrot.slane %v2478_v39, %v3793_v57 }
 0x9df   : > { %v2499_v47 = vrot.slane %v2471_v23, %v3789_v52  ;;  %v2502_v36 = vcombine.high %v2492_v61, %v2492_v61  ;;  %v2501_v53 = vcombine.high %v2485_v43, %v2485_v43  ;;  %v2511_v33 = vrot.slane %v2492_v61, %v3793_v57 }
 0x9e0   : > { %v2704_v45 = vrot.slane %v2675_v10, %v3793_v57  ;;  %v2689_v26 = vrot.slane %v2667_v6, %v3789_v52  ;;  %v2697_v11 = vcombine.high %v2675_v10, %v2675_v10  ;;  %v2668_v13 = vcombine.high %v2666_v25, %v2666_v25 }
 0x9e1   : > { %v2682_v20 = vrot.slane %v2666_v25, %v3789_v52  ;;  %v2503_v32 = vcombine.high %v2499_v47, %v2499_v47  ;;  %v2515_v42 = vrot.slane %v2500_v17, %v3793_v57  ;;  %v2519_v34 = vrot.slane %v2502_v36, %v3793_v57 }
 0x9e2   : > { %2733 = vrot.lane.b32.xlu0 %v2704_v45, %s3536_s2  ;;  %v2708_v28 = vrot.slane %v2689_v26, %v3793_v57  ;;  %v2699_v30 = vcombine.high %v2689_v26, %v2689_v26  ;;  %v2712_v9 = vrot.slane %v2697_v11, %v3793_v57  ;;  %v2696_v63 = vrot.slane %v2668_v13, %v3789_v52 }
 0x9e3   : > { %v2720_v12 = vrot.slane %v2682_v20, %v3793_v57  ;;  %v2698_v31 = vcombine.high %v2682_v20, %v2682_v20  ;;  %v2523_v35 = vrot.slane %v2485_v43, %v3793_v57  ;;  %v2531_v21 = vrot.slane %v2501_v53, %v3793_v57 }
 0x9e4   : > { %2735 = vrot.lane.b32.xlu1 %v2708_v28, %s3536_s2  ;;  %v2716_v49 = vrot.slane %v2699_v30, %v3793_v57  ;;  %v2724_v29 = vrot.slane %v2696_v63, %v3793_v57  ;;  %v2700_v40 = vcombine.high %v2696_v63, %v2696_v63  ;;  %v2527_v52 = vrot.slane %v2499_v47, %v3793_v57 }
 0x9e5   : > { %v2728_v38 = vrot.slane %v2698_v31, %v3793_v57  ;;  %v2535_v16 = vrot.slane %v2503_v32, %v3793_v57 }
 0x9e6   : > { %2737 = vrot.lane.b32.xlu0 %v2712_v9, %s3536_s2  ;;  %v2732_v48 = vrot.slane %v2700_v40, %v3793_v57 }
 0x9e8   : > { %2739 = vrot.lane.b32.xlu1 %v2716_v49, %s3536_s2 }
 0x9ea   : > { %2741 = vrot.lane.b32.xlu0 %v2720_v12, %s3536_s2 }
 0x9ec   : > { %2743 = vrot.lane.b32.xlu1 %v2724_v29, %s3536_s2 }
 0x9ee   : > { %2745 = vrot.lane.b32.xlu0 %v2728_v38, %s3536_s2 }
 0x9f0   : > { %2747 = vrot.lane.b32.xlu1 %v2732_v48, %s3536_s2  ;;  %s3042_s2 = sshll.u32 %s469_s28, 3 }
 0xa4b   : > { %v2545_v51 = vpop.permute.xlu1 %2544 }
 0xa4c   : > { %v2547_v60 = vadd.f32 %v2545_v51, %v2507_v37  ;;  %v2548_v24 = vadd.f32 %v2545_v51, %v2511_v33  ;;  %v2549_v27 = vadd.f32 %v2545_v51, %v2515_v42  ;;  %v2550_v50 = vadd.f32 %v2545_v51, %v2519_v34 }
 0xa4d   : > { %v2551_v62 = vadd.f32 %v2545_v51, %v2523_v35  ;;  %v2552_v0 = vadd.f32 %v2545_v51, %v2527_v52  ;;  %v2553_v1 = vadd.f32 %v2545_v51, %v2531_v21  ;;  %v2554_v7 = vadd.f32 %v2545_v51, %v2535_v16 }
 0xa4e   : > { %v2587_v54 = vadd.f32 %v2564_v58, %v2547_v60  ;;  %v2588_v8 = vadd.f32 %v2566_v56, %v2548_v24  ;;  %v2589_v5 = vadd.f32 %v2568_v22, %v2549_v27  ;;  %v2590_v4 = vadd.f32 %v2570_v44, %v2550_v50 }
 0xa4f   : > { %v2591_v10 = vadd.f32 %v2572_v55, %v2551_v62  ;;  %v2592_v6 = vadd.f32 %v2574_v41, %v2552_v0  ;;  %v2578_v25 = vpop.permute.xlu1 %2577  ;;  %v2593_v45 = vadd.f32 %v2576_v3, %v2553_v1 }
 0xa50   : > { %v2597_v26 = vsel %vm600_vm2, %v2587_v54, -inf  ;;  %v2598_v57 = vsel %vm600_vm2, %v2588_v8, -inf  ;;  %v2599_v11 = vsel %vm600_vm2, %v2589_v5, -inf  ;;  %v2594_v13 = vadd.f32 %v2578_v25, %v2554_v7 }
 0xa51   : > { %v2601_v28 = vsel %vm600_vm2, %v2591_v10, -inf  ;;  %v2603_v30 = vsel %vm600_vm2, %v2592_v6, -inf  ;;  %v2605_v9 = vsel %vm600_vm2, %v2593_v45, -inf  ;;  %v2600_v63 = vsel %vm600_vm2, %v2590_v4, -inf }
 0xa52   : > { %v2602_v20 = vmax.f32 %v2597_v26, %v2601_v28  ;;  %v2604_v49 = vmax.f32 %v2598_v57, %v2603_v30  ;;  %v2607_v12 = vsel %vm600_vm2, %v2594_v13, -inf  ;;  %v2606_v31 = vmax.f32 %v2599_v11, %v2605_v9 }
 0xa53   : > { %v2608_v29 = vmax.f32 %v2600_v63, %v2607_v12 }
 0xa54   : > { %v2609_v40 = vmax.f32 %v2602_v20, %v2604_v49  ;;  %v2734_v41 = vpop.permute.xlu0 %2733 }
 0xa55   : > { %v2610_v38 = vmax.f32 %v2606_v31, %v2608_v29 }
 0xa56   : > { %v2736_v32 = vpop.permute.xlu1 %2735 }
 0xa57   : > { %v2611_v48 = vmax.f32 %v2609_v40, %v2610_v38 }
 0xa58   : > { %v2738_v52 = vpop.permute.xlu0 %2737 }
 0xa59   : > { %v2615_v46 = vsub.f32 %v2590_v4, %v2611_v48  ;;  %v2612_v14 = vsub.f32 %v2587_v54, %v2611_v48  ;;  %v2613_v56 = vsub.f32 %v2588_v8, %v2611_v48  ;;  %v2614_v19 = vsub.f32 %v2589_v5, %v2611_v48 }
 0xa5a   : > { %v2616_v44 = vsub.f32 %v2591_v10, %v2611_v48  ;;  %v2617_v39 = vsub.f32 %v2592_v6, %v2611_v48  ;;  %v2618_v43 = vsub.f32 %v2593_v45, %v2611_v48  ;;  %v2619_v47 = vsub.f32 %v2594_v13, %v2611_v48  ;;  %v2740_v62 = vpop.permute.xlu1 %2739 }
 0xa5b   : > { %v2626_v58 = vmul.f32 1.442695, %v2615_v46  ;;  %v2620_v59 = vmul.f32 1.442695, %v2612_v14  ;;  %v2622_v23 = vmul.f32 1.442695, %v2613_v56 }
 0xa5c   : > { %v2624_v22 = vmul.f32 1.442695, %v2614_v19  ;;  %v2628_v61 = vmul.f32 1.442695, %v2616_v44  ;;  %v2630_v17 = vmul.f32 1.442695, %v2617_v39  ;;  %v2742_v25 = vpop.permute.xlu0 %2741 }
 0xa5d   : > { %3446 = vpow2.f32 %v2626_v58  ;;  %v2632_v36 = vmul.f32 1.442695, %v2618_v43  ;;  %v2634_v53 = vmul.f32 1.442695, %v2619_v47 }
 0xa5e   : > { %3448 = vpow2.f32 %v2620_v59  ;;  %v2744_v20 = vpop.permute.xlu1 %2743 }
 0xa5f   : > { %3450 = vpow2.f32 %v2622_v23 }
 0xa60   : > { %3452 = vpow2.f32 %v2624_v22  ;;  %v2746_v48 = vpop.permute.xlu0 %2745 }
 0xa61   : > { %3454 = vpow2.f32 %v2628_v61 }
 0xa62   : > { %3456 = vpow2.f32 %v2630_v17  ;;  %v2748_v19 = vpop.permute.xlu1 %2747 }
 0xa63   : > { %3458 = vpow2.f32 %v2632_v36 }
 0xa64   : > { %3460 = vpow2.f32 %v2634_v53  ;;  %v2866_v53 = vld [vmem:[%s4332_s12] sm:$0xff] }
 0xa67   : > { %v3447_v55 = vpop.eup %3446 }
 0xa68   : > { %v3449_v37 = vpop.eup %3448  ;;  %v2760_v7 = vmul.f32 %v3447_v55, %v2740_v62  ;;  %v2641_v54 = vsel %vm600_vm2, %v3447_v55, 0.0  ;;  %v2868_v55 = vld [vmem:[%s4332_s12 + $0x10] sm:$0xff] }
 0xa69   : > { %v3451_v33 = vpop.eup %3450  ;;  %v2636_v42 = vsel %vm600_vm2, %v3449_v37, 0.0  ;;  %v2757_v34 = vmul.f32 %v3449_v37, %v2734_v41 }
 0xa6a   : > { %v3453_v35 = vpop.eup %3452  ;;  %v2637_v21 = vsel %vm600_vm2, %v3451_v33, 0.0  ;;  %v2758_v51 = vmul.f32 %v3451_v33, %v2736_v32  ;;  %v2770_v26 = vsel %vm600_vm2, %v2760_v7, 0.0  ;;  %v2867_v32 = vld [vmem:[%s4332_s12 + $0x8] sm:$0xff]  ;;  %v2869_v33 = vld [vmem:[%s4332_s12 + $0x18] sm:$0xff] }
 0xa6b   : > { %v2765_v16 = vsel %vm600_vm2, %v2757_v34, 0.0  ;;  %v2638_v60 = vadd.f32 %v2637_v21, %v2636_v42  ;;  %v2759_v24 = vmul.f32 %v3453_v35, %v2738_v52  ;;  %v2639_v50 = vsel %vm600_vm2, %v3453_v35, 0.0  ;;  %v3455_v0 = vpop.eup %3454 }
 0xa6c   : > { %v2766_v27 = vsel %vm600_vm2, %v2758_v51, 0.0  ;;  %v3457_v5 = vpop.eup %3456  ;;  %v2643_v6 = vsel %vm600_vm2, %v3455_v0, 0.0  ;;  %v2761_v57 = vmul.f32 %v3455_v0, %v2742_v25  ;;  %v3349_v37 = vpack.c.bf16 %v2867_v32, %v2866_v53 }
 0xa6d   : > { %v2767_v1 = vadd.f32 %v2766_v27, %v2765_v16  ;;  %v2640_v3 = vadd.f32 %v2639_v50, %v2638_v60  ;;  %v2768_v8 = vsel %vm600_vm2, %v2759_v24, 0.0  ;;  %v3459_v45 = vpop.eup %3458  ;;  %v2645_v30 = vsel %vm600_vm2, %v3457_v5, 0.0 }
 0xa6e   : > { %v3461_v13 = vpop.eup %3460  ;;  %v2647_v49 = vsel %vm600_vm2, %v3459_v45, 0.0  ;;  %v2772_v63 = vsel %vm600_vm2, %v2761_v57, 0.0  ;;  %v2762_v12 = vmul.f32 %v3457_v5, %v2744_v20  ;;  %v2763_v14 = vmul.f32 %v3459_v45, %v2746_v48  ;;  %3350 = vmatpush3.bf16.msra.mxu0 %v3349_v37 }
 0xa6f   : > { %v2769_v4 = vadd.f32 %v2768_v8, %v2767_v1  ;;  %v2642_v10 = vadd.f32 %v2641_v54, %v2640_v3  ;;  %v2649_v29 = vsel %vm600_vm2, %v3461_v13, 0.0  ;;  %v2764_v59 = vmul.f32 %v3461_v13, %v2748_v19  ;;  %3351 = vmatprep.subr.bf16.mxu0 %v3532_v2  ;;  %v3081_v2 = vld [vmem:[%s4333_s13] ss:$0 sm:$0xff] }
 0xa70   : > { %v2774_v46 = vsel %vm600_vm2, %v2762_v12, 0.0  ;;  %v2776_v58 = vsel %vm600_vm2, %v2763_v14, 0.0  ;;  %v3352_v42 = vpack.c.bf16 %v2869_v33, %v2868_v55 }
 0xa71   : > { %v2644_v11 = vadd.f32 %v2643_v6, %v2642_v10  ;;  %v2771_v28 = vadd.f32 %v2770_v26, %v2769_v4  ;;  %v2778_v44 = vsel %vm600_vm2, %v2764_v59, 0.0 }
 0xa72   : > { %3353 = vmatpush3.bf16.msra.mxu0 %v3352_v42 }
 0xa73   : > { %v2646_v9 = vadd.f32 %v2645_v30, %v2644_v11  ;;  %v2773_v40 = vadd.f32 %v2772_v63, %v2771_v28 }
 0xa75   : > { %v2648_v31 = vadd.f32 %v2647_v49, %v2646_v9  ;;  %v2775_v56 = vadd.f32 %v2774_v46, %v2773_v40 }
 0xa77   : > { %v2650_v38 = vadd.f32 %v2649_v29, %v2648_v31  ;;  %v2777_v23 = vadd.f32 %v2776_v58, %v2775_v56 }
 0xa79   : > { %3462 = vrcp.f32 %v2650_v38  ;;  %v2779_v22 = vadd.f32 %v2778_v44, %v2777_v23 }
 0xa83   : > { %v3463_v39 = vpop.eup %3462 }
 0xa84   : > { %v2781_v61 = vmul.f32 %v3463_v39, %v2779_v22 }
 0xa86   : > { %v2782_v43 = vsub.f32 0.0, %v2781_v61 }
 0xa88   : > { %v2783_v47 = vmul.f32 1.442695, %v2782_v43 }
 0xa8a   : > { %3464 = vpow2.f32 %v2783_v47 }
 0xa94   : > { %v3465_v17 = vpop.eup %3464 }
 0xa95   : > { %v2785_v36 = vadd.f32 1.0, %v3465_v17 }
 0xa97   : > { %3466 = vrcp.f32 %v2785_v36 }
 0xaa1   : > { %v3467_v41 = vpop.eup %3466 }
 0xaa2   : > { %3260 = vmatmul.mubr.msk.f32.vlgmr.msra.gmra.mrb[12].mxu1 %vm600_vm2, %v3467_v41 }
 0xb75   : > { %v2856_v34 = vpop.f32.mrb[12].mxu1 }
 0xb76   : > { %2861 = vrot.lane.b32.xlu0 %v2856_v34, %s3537_s0  ;;  %v3261_v35 = vpop.f32.mrb[13].mxu1  ;;  %s471_s0 = scalar_lea.vmem [#allocation2], %s3042_s2  ;;  %s3472_s2 = sshll.u32 %s3540_s17, 4  ;;  %s3473_s2 = int_to_ptr.vmem [resolvable:$false] %s3472_s2 }
 0xb77   : > { %s2967_s18 = sshll.u32 %s471_s0, 4  ;;  %s3474_s26 = scalar_lea.vmem %s3473_s2, 256  ;;  %s4279_s18 = int_to_ptr.vmem [resolvable:$true] %s2967_s18 }
 0xb78   : > { %s3468_s22 = scalar_lea.vmem %s4279_s18, 128  ;;  %p3475_p0 = scmp.lt.s32.totalorder %s4279_s18, %s3473_s2 }
 0xb79   : > { %p3469_p11 = scmp.ne.s32.totalorder %s4279_s18, %s3468_s22  ;;  %p3476_p1 = scmp.lt.s32.totalorder %s3474_s26, %s3468_s22 }
 0xb7b   : > { %p3470_p12 = pnand %p3469_p11, %p3654_p5  ;;  %p3477_p2 = por %p3476_p1, %p3475_p0 }
 0xb7d   : > { %p3471_p13 = pneg %p3470_p12 }
 0xb7f   : > { %p3478_p3 = pnand %p3477_p2, %p3471_p13 }
 0xbe8   : > { %v2862_v21 = vpop.permute.xlu0 %2861 }
 0xbe9   : > { %v2864_v51 = vadd.f32 %v2862_v21, %v4184_v18 }
 0xbeb   : > { %v2865_v52 = vadd.f32 %v2864_v51, %v3970_v15 }
 0xbed   : > { %2878 = vrot.lane.b32.xlu1 %v2865_v52, %s3539_s25  ;;  %s4277_s25 = scalar_lea.hbm %s4334_s14, %s3084_s27 }
 0xc5f   : > { %v2879_v16 = vpop.permute.xlu1 %2878 }
 0xc60   : > { %3271 = vmatmul.mubr.msk.f32.vlgmr.msra.gmra.mrb[26].mxu0 %vm600_vm2, %v2879_v16 }
 0xd33   : > { %v2948_v60 = vpop.f32.mrb[26].mxu0 }
 0xd34   : > { %v2949_v24 = vadd.f32 %v3081_v2, %v2948_v60  ;;  %v3272_v18 = vpop.f32.mrb[27].mxu0 }
 0xd36   : > { %2952 = vst.msk [vmem:[%s471_s0] sm:$0xff] %vm515_vm1, %v2949_v24 }
 0xd37   : > { %3481 = shalt.err (!%p3478_p3)
}
 0xd38   : > { %s3482_s28 = scalar_lea.hbm %s4277_s25, 128  ;;  %s3486_s20 = scalar_lea.hbm %s4334_s14, 256 }
 0xd39   : > { %p3483_p4 = scmp.ne.s32.totalorder %s4277_s25, %s3482_s28  ;;  %p3487_p9 = scmp.lt.u32.totalorder %s4277_s25, %s4334_s14 }
 0xd3a   : > { %p3488_p10 = scmp.lt.u32.totalorder %s3486_s20, %s3482_s28  ;;  %p3490_p12 = scmp.lt.u32.totalorder %s3482_s28, %s4277_s25 }
 0xd3b   : > { %p3484_p7 = pnand %p3483_p4, %p3654_p5 }
 0xd3c   : > { %p3489_p11 = por %p3488_p10, %p3487_p9 }
 0xd3d   : > { %p3485_p8 = pneg %p3484_p7 }
 0xd3e   : > { %p3491_p13 = por %p3490_p12, %p3489_p11 }
 0xd40   : > { %p3492_p0 = pnand %p3491_p13, %p3485_p8 }
 0xd42   : > { %3495 = shalt.err (!%p3492_p0)
}
 0xd43   : > { %3354 = dma.vmem_to_hbm [thread:$0]  (%p3654_p5), %s4279_s18, 128, %s4277_s25, %s2954_s21  }
 0xd44 PF: > { %p3360_p1 = scmp.ge.s32.totalorder %s3530_s16, 2  ;;  %s2979_s22 = sand.u32 1, %s3518_s29  }
 0xd45   : > { %s2980_s2 = scalar_lea.sflag [#allocation3], %s2979_s22 }
 0xd46   : > { %p3357_p2 = pnand %p3360_p1, %p3658_p6 }
 0xd48   : > { %3513 = dma.done.wait (!%p3357_p2), %s2980_s2, 128  }
 0xd49   : > { %3515 = vsyncadd (!%p3357_p2), %s2980_s2, 4294967168  ;;  %s4346_s26 = sld [smem:[#allocation5_spill]]  ;;  %p24_p3 = scmp.ge.s32.totalorder %s3641_s19, 4  }
 0xd4a   : > { %s4347_s29 = smov %s3522_s30  ;;  %s4348_s30 = smov %s3526_s15 }
 0xd4b   : > { %s4350_s16 = smov %s3641_s19  ;;  %26 = sbr.rel (!%p24_p3) target bundleno = 7 (0x7), region = 114 }
 0xd4f   : > { %s4349_s15 = smov %s4346_s26 }
 0xd52   :  { %2985 = vsyncpa [#allocation3], 1 }
 0xd53   :  { %2987 = vsyncpa [#allocation3 + $0x1], 1 }

</bundles_post_ra>
